<compile_context>
chip_gen: v6e
topology: v6e:2x2x1
jax: 0.10.0
libtpu: 0.0.40
codegen_flags: <defaults>
</compile_context>

<pallas_src>
import functools

import jax
import jax.numpy as jnp
from jax.experimental import pallas as pl
from jax.experimental.pallas import tpu as pltpu

LANE = 128     # lane width (last dim)
SUBLANE = 8    # f32 sublane count (second-to-last dim)


def _rup(n, m):
    return ((n + m - 1) // m) * m


def _pad2(a, rows, cols):
    r, c = a.shape
    return jnp.pad(a, ((0, rows - r), (0, cols - c)))


def _max_batch_tile():
    """256-row batch tiles on 256-wide-MXU chips (v6e/v7x), 128 on v5e/v4."""
    try:
        kind = jax.devices()[0].device_kind.lower()
    except Exception:
        return 128
    if "v6" in kind or "7x" in kind or "v7" in kind:
        return 256
    return 128


# ----------------------------------------------------------------------------
# Fused Pallas kernel: whole VAE forward for one batch tile.
# ----------------------------------------------------------------------------
def _ff_fused_kernel(*refs, n_enc, n_dec, half, fused_half):
    it = iter(refs)
    x_ref = next(it)
    eps_ref = next(it)
    enc_w = [next(it) for _ in range(n_enc)]
    w_ms_ref = next(it)
    dec_w = [next(it) for _ in range(n_dec)]
    b_all_ref = next(it)                      # (L, maxN) f32, one row per layer
    out_ref, mean_ref, std_ref = next(it), next(it), next(it)

    def linear(h, w_ref, li, act):
        # bf16 operands on the MXU, f32 accumulate, f32 epilogue (v5e-safe).
        fo = w_ref.shape[1]
        y = jnp.dot(h.astype(w_ref.dtype), w_ref[...],
                    preferred_element_type=jnp.float32)
        y = y + b_all_ref[li:li + 1, :fo]          # (1, fo) broadcast, f32
        if act == "relu":
            y = jnp.maximum(y, 0.0)
        elif act == "sigmoid":
            y = jax.nn.sigmoid(y)
        return y

    # encoder
    h = x_ref[...].astype(jnp.float32)
    for li in range(n_enc):
        h = linear(h, enc_w[li], li, "relu")

    # fused fc_mu / fc_std (single matmul)
    ms = linear(h, w_ms_ref, n_enc, "none")
    if fused_half:
        # mu in lanes [0, half), std in lanes [half, 2*half) of ONE 128-lane
        # group; realign std to lane 0 on the XLU (idle slot here).
        mean = ms
        std = pltpu.roll(ms, shift=half, axis=1)
    else:
        mean = ms[:, :half]
        std = ms[:, half:]

    # reparameterization: z = mean + std * eps  (VPU elementwise, f32).
    # Junk lanes beyond latent_size are finite and hit zero-padded decoder
    # weight rows, so they contribute nothing.
    z = mean + std * eps_ref[...].astype(jnp.float32)

    # decoder (last layer fused with sigmoid)
    h = z
    for li in range(n_dec):
        act = "sigmoid" if li == n_dec - 1 else "relu"
        h = linear(h, dec_w[li], n_enc + 1 + li, act)

    out_ref[...] = h.astype(out_ref.dtype)
    mean_ref[...] = mean.astype(mean_ref.dtype)
    std_ref[...] = std.astype(std_ref.dtype)


# ----------------------------------------------------------------------------
# Parameter construction (deterministic, PyTorch nn.Linear-style init)
# ----------------------------------------------------------------------------
def _init_linear(key, fan_in, fan_out):
    kw, kb = jax.random.split(key)
    bound = 1.0 / jnp.sqrt(fan_in)
    w = jax.random.uniform(kw, (fan_in, fan_out), jnp.float32, -bound, bound)
    b = jax.random.uniform(kb, (1, fan_out), jnp.float32, -bound, bound)
    return w, b


def make_params(key, in_size, hidden_size, latent_size, n_layers):
    params = {"encoder": [], "decoder": []}
    keys = jax.random.split(key, 2 * n_layers + 3)
    k = iter(keys)

    # encoder: in_size -> hidden, then (n_layers-1) x hidden -> hidden
    dims = [in_size] + [hidden_size] * n_layers
    for i in range(n_layers):
        params["encoder"].append(_init_linear(next(k), dims[i], dims[i + 1]))

    params["fc_mu"] = _init_linear(next(k), hidden_size, latent_size)
    params["fc_std"] = _init_linear(next(k), hidden_size, latent_size)

    # decoder: latent -> hidden, (n_layers-1) x hidden -> hidden, hidden -> in
    ddims = [latent_size] + [hidden_size] * n_layers + [in_size]
    for i in range(n_layers + 1):
        params["decoder"].append(_init_linear(next(k), ddims[i], ddims[i + 1]))
    return params


def pack_params(params, in_size, hidden_size, latent_size,
                w_dtype=jnp.bfloat16):
    """Pad feature dims to 128 lanes, fuse mu/std, stack biases, cast to bf16.

    Returns (weights, b_all, fused_half, half):
      weights : list of bf16 [Fi_pad, Fo_pad] matrices (enc..., fused_ms, dec...)
      b_all   : f32 [L, maxN] — one bias row per layer, same order.
    """
    in_p = _rup(in_size, LANE)
    hid_p = _rup(hidden_size, LANE)
    lat_p = _rup(latent_size, LANE)

    fused_half = (2 * latent_size <= LANE)
    half = LANE // 2 if fused_half else lat_p
    fused_w = LANE if fused_half else 2 * lat_p

    weights, bias_rows = [], []

    def add(w, b, rows, cols):
        weights.append(_pad2(w, rows, cols).astype(w_dtype))
        bias_rows.append(_pad2(b, 1, cols).astype(jnp.float32))

    # encoder
    edims = [in_p] + [hid_p] * len(params["encoder"])
    for li, (w, b) in enumerate(params["encoder"]):
        add(w, b, edims[li], edims[li + 1])

    # fused mu/std: mu in cols [0, latent), std in cols [half, half+latent)
    w_mu, b_mu = params["fc_mu"]
    w_sd, b_sd = params["fc_std"]
    w_ms = jnp.zeros((hid_p, fused_w), jnp.float32)
    w_ms = w_ms.at[: w_mu.shape[0], : w_mu.shape[1]].set(w_mu)
    w_ms = w_ms.at[: w_sd.shape[0], half: half + w_sd.shape[1]].set(w_sd)
    b_ms = jnp.zeros((1, fused_w), jnp.float32)
    b_ms = b_ms.at[:, : b_mu.shape[1]].set(b_mu)
    b_ms = b_ms.at[:, half: half + b_sd.shape[1]].set(b_sd)
    weights.append(w_ms.astype(w_dtype))
    bias_rows.append(b_ms)

    # decoder
    ddims = [lat_p] + [hid_p] * (len(params["decoder"]) - 1) + [in_p]
    for li, (w, b) in enumerate(params["decoder"]):
        add(w, b, ddims[li], ddims[li + 1])

    max_n = max(br.shape[1] for br in bias_rows)
    b_all = jnp.concatenate([_pad2(br, 1, max_n) for br in bias_rows], axis=0)
    return weights, b_all.astype(jnp.float32), fused_half, half


# ----------------------------------------------------------------------------
# Forward pass: single fused pallas_call.
# ----------------------------------------------------------------------------
def ff_model_forward(params, x, eps, *, in_size, hidden_size, latent_size):
    B = x.shape[0]
    xf = x.reshape(B, -1).astype(jnp.float32)       # x.view(x.shape[0], -1)
    assert xf.shape[1] == in_size

    in_p = _rup(in_size, LANE)
    lat_p = _rup(latent_size, LANE)

    # Batch tile: >=8 sublanes; 256 rows on 256-wide-MXU chips, 128 otherwise.
    TB = min(_rup(B, SUBLANE), _max_batch_tile())
    B_pad = _rup(B, TB)

    x_pad = _pad2(xf, B_pad, in_p)
    eps_pad = _pad2(eps.astype(jnp.float32), B_pad, lat_p)

    weights, b_all, fused_half, half = pack_params(
        params, in_size, hidden_size, latent_size)
    n_enc = len(params["encoder"])
    n_dec = len(params["decoder"])

    kernel = functools.partial(_ff_fused_kernel, n_enc=n_enc, n_dec=n_dec,
                               half=half, fused_half=fused_half)

    # Explicit VMEM budget: weights (budgeted x2 in case single-buffering is
    # unavailable) + double-buffered batch-tile IO + slack.
    weight_bytes = sum(int(w.size) * w.dtype.itemsize for w in weights)
    weight_bytes += int(b_all.size) * 4
    io_bytes = 4 * TB * (in_p + lat_p)              # x + eps tiles
    o_bytes = 4 * TB * (in_p + 2 * lat_p)           # out, mean, std tiles
    vmem_need = 2 * weight_bytes + 2 * (io_bytes + o_bytes) + (2 << 20)
    vmem_limit = int(min(max(vmem_need, 16 << 20), 100 << 20))

    def rowspec(cols):
        return pl.BlockSpec((TB, cols), lambda i: (i, 0))

    def build(single_buffer_weights):
        def wspec(shape):
            # Loop-invariant blocks (constant index_map): single-buffer them.
            if single_buffer_weights:
                return pl.BlockSpec(shape, lambda i: (0, 0),
                                    pipeline_mode=pl.Buffered(1))
            return pl.BlockSpec(shape, lambda i: (0, 0))

        in_specs = [rowspec(in_p), rowspec(lat_p)]
        in_specs += [wspec(w.shape) for w in weights]
        in_specs += [wspec(b_all.shape)]

        return pl.pallas_call(
            kernel,
            out_shape=(
                jax.ShapeDtypeStruct((B_pad, in_p), jnp.float32),
                jax.ShapeDtypeStruct((B_pad, lat_p), jnp.float32),
                jax.ShapeDtypeStruct((B_pad, lat_p), jnp.float32),
            ),
            grid=(B_pad // TB,),
            in_specs=in_specs,
            out_specs=(rowspec(in_p), rowspec(lat_p), rowspec(lat_p)),
            compiler_params=pltpu.CompilerParams(
                dimension_semantics=("parallel",),
                vmem_limit_bytes=vmem_limit),
        )

    args = (x_pad, eps_pad, *weights, b_all)
    try:
        out_p, mean_p, std_p = build(True)(*args)
    except Exception:
        # Fallback: default (double) buffering on the weight blocks.
        out_p, mean_p, std_p = build(False)(*args)

    out = out_p[:B, :in_size]
    mean = mean_p[:B, :latent_size]
    std = std_p[:B, :latent_size]
    return out, mean, std


# ----------------------------------------------------------------------------
# Pure-JAX reference (same bf16 weight/activation quantization as the kernel)
# ----------------------------------------------------------------------------
def _ref_forward(params, x, eps):
    def q(a):
        return a.astype(jnp.bfloat16).astype(jnp.float32)

    def lin(h, w, b):
        return jnp.dot(q(h), q(w), preferred_element_type=jnp.float32) + b

    h = x.reshape(x.shape[0], -1).astype(jnp.float32)
    for w, b in params["encoder"]:
        h = jnp.maximum(lin(h, w, b), 0.0)
    mean = lin(h, *params["fc_mu"])
    std = lin(h, *params["fc_std"])
    z = mean + std * eps
    h = z
    for w, b in params["decoder"][:-1]:
        h = jnp.maximum(lin(h, w, b), 0.0)
    out = jax.nn.sigmoid(lin(h, *params["decoder"][-1]))
    return out, mean, std


# ----------------------------------------------------------------------------
if __name__ == "__main__":
    B, C, H, W = 2, 4, 4, 4
    in_size = C * H * W            # 64
    hidden_size = 32
    latent_size = 16
    n_layers = 2
    p_dropout = 0.1                # identity at inference

    key = jax.random.PRNGKey(0)
    kx, kp, ke = jax.random.split(key, 3)

    x = jax.random.normal(kx, (B, C, H, W), dtype=jnp.float32)
    params = make_params(kp, in_size, hidden_size, latent_size, n_layers)
    eps = jax.random.normal(ke, (B, latent_size), dtype=jnp.float32)

    out, mean, std = ff_model_forward(
        params, x, eps,
        in_size=in_size, hidden_size=hidden_size, latent_size=latent_size)
    jax.block_until_ready((out, mean, std))

    assert out.shape == (B, in_size)
    assert mean.shape == (B, latent_size)
    assert std.shape == (B, latent_size)

    r_out, r_mean, r_std = _ref_forward(params, x, eps)
    assert jnp.allclose(out, r_out, rtol=2e-2, atol=2e-2)
    assert jnp.allclose(mean, r_mean, rtol=2e-2, atol=2e-2)
    assert jnp.allclose(std, r_std, rtol=2e-2, atol=2e-2)

    print("KERNEL_OK")
</pallas_src>

<mosaic_0001>
module attributes {stable_mosaic.version = 11 : i64} {
  func.func @_ff_fused_kernel(%arg0: i32, %arg1: memref<8x128xf32, #tpu.memory_space<vmem>>, %arg2: memref<8x128xf32, #tpu.memory_space<vmem>>, %arg3: memref<128x128xbf16, #tpu.memory_space<vmem>>, %arg4: memref<128x128xbf16, #tpu.memory_space<vmem>>, %arg5: memref<128x128xbf16, #tpu.memory_space<vmem>>, %arg6: memref<128x128xbf16, #tpu.memory_space<vmem>>, %arg7: memref<128x128xbf16, #tpu.memory_space<vmem>>, %arg8: memref<128x128xbf16, #tpu.memory_space<vmem>>, %arg9: memref<6x128xf32, #tpu.memory_space<vmem>>, %arg10: memref<8x128xf32, #tpu.memory_space<vmem>>, %arg11: memref<8x128xf32, #tpu.memory_space<vmem>>, %arg12: memref<8x128xf32, #tpu.memory_space<vmem>>) attributes {dimension_semantics = [#tpu.dimension_semantics<parallel>], iteration_bounds = array<i64: 1>, scalar_prefetch = 0 : i64, scratch_operands = 0 : i64, tpu.core_type = #tpu.core_type<tc>, window_params = [{transform_indices = @transform_0, window_bounds = array<i64: 8, 128>}, {transform_indices = @transform_1, window_bounds = array<i64: 8, 128>}, {pipeline_mode = #tpu.pipeline_mode<synchronous>, transform_indices = @transform_2, window_bounds = array<i64: 128, 128>}, {pipeline_mode = #tpu.pipeline_mode<synchronous>, transform_indices = @transform_3, window_bounds = array<i64: 128, 128>}, {pipeline_mode = #tpu.pipeline_mode<synchronous>, transform_indices = @transform_4, window_bounds = array<i64: 128, 128>}, {pipeline_mode = #tpu.pipeline_mode<synchronous>, transform_indices = @transform_5, window_bounds = array<i64: 128, 128>}, {pipeline_mode = #tpu.pipeline_mode<synchronous>, transform_indices = @transform_6, window_bounds = array<i64: 128, 128>}, {pipeline_mode = #tpu.pipeline_mode<synchronous>, transform_indices = @transform_7, window_bounds = array<i64: 128, 128>}, {pipeline_mode = #tpu.pipeline_mode<synchronous>, transform_indices = @transform_8, window_bounds = array<i64: 6, 128>}, {transform_indices = @transform_9, window_bounds = array<i64: 8, 128>}, {transform_indices = @transform_10, window_bounds = array<i64: 8, 128>}, {transform_indices = @transform_11, window_bounds = array<i64: 8, 128>}]} {
    %c0 = arith.constant 0 : index
    %c0_0 = arith.constant 0 : index
    %0 = vector.load %arg1[%c0, %c0_0] : memref<8x128xf32, #tpu.memory_space<vmem>>, vector<8x128xf32>
    %1 = arith.truncf %0 : vector<8x128xf32> to vector<8x128xbf16>
    %c0_1 = arith.constant 0 : index
    %c0_2 = arith.constant 0 : index
    %2 = vector.load %arg3[%c0_1, %c0_2] : memref<128x128xbf16, #tpu.memory_space<vmem>>, vector<128x128xbf16>
    %cst = arith.constant dense<0.000000e+00> : vector<8x128xf32>
    %3 = tpu.matmul %1, %2, %cst {dimension_numbers = #tpu.dot_dimension_numbers<[1], [0], [0], [1], [0, 0, 1, 1], [], []>} : vector<8x128xbf16>, vector<128x128xbf16>, vector<8x128xf32> -> vector<8x128xf32>
    %c0_3 = arith.constant 0 : index
    %c0_4 = arith.constant 0 : index
    %4 = vector.load %arg9[%c0_3, %c0_4] : memref<6x128xf32, #tpu.memory_space<vmem>>, vector<1x128xf32>
    %5 = vector.broadcast %4 : vector<1x128xf32> to vector<8x128xf32>
    %6 = arith.addf %3, %5 : vector<8x128xf32>
    %cst_5 = arith.constant 0.000000e+00 : f32
    %7 = vector.broadcast %cst_5 : f32 to vector<8x128xf32>
    %8 = arith.maximumf %6, %7 : vector<8x128xf32>
    %9 = arith.truncf %8 : vector<8x128xf32> to vector<8x128xbf16>
    %c0_6 = arith.constant 0 : index
    %c0_7 = arith.constant 0 : index
    %10 = vector.load %arg4[%c0_6, %c0_7] : memref<128x128xbf16, #tpu.memory_space<vmem>>, vector<128x128xbf16>
    %cst_8 = arith.constant dense<0.000000e+00> : vector<8x128xf32>
    %11 = tpu.matmul %9, %10, %cst_8 {dimension_numbers = #tpu.dot_dimension_numbers<[1], [0], [0], [1], [0, 0, 1, 1], [], []>} : vector<8x128xbf16>, vector<128x128xbf16>, vector<8x128xf32> -> vector<8x128xf32>
    %c1 = arith.constant 1 : index
    %c0_9 = arith.constant 0 : index
    %12 = vector.load %arg9[%c1, %c0_9] : memref<6x128xf32, #tpu.memory_space<vmem>>, vector<1x128xf32>
    %13 = vector.broadcast %12 : vector<1x128xf32> to vector<8x128xf32>
    %14 = arith.addf %11, %13 : vector<8x128xf32>
    %cst_10 = arith.constant 0.000000e+00 : f32
    %15 = vector.broadcast %cst_10 : f32 to vector<8x128xf32>
    %16 = arith.maximumf %14, %15 : vector<8x128xf32>
    %17 = arith.truncf %16 : vector<8x128xf32> to vector<8x128xbf16>
    %c0_11 = arith.constant 0 : index
    %c0_12 = arith.constant 0 : index
    %18 = vector.load %arg5[%c0_11, %c0_12] : memref<128x128xbf16, #tpu.memory_space<vmem>>, vector<128x128xbf16>
    %cst_13 = arith.constant dense<0.000000e+00> : vector<8x128xf32>
    %19 = tpu.matmul %17, %18, %cst_13 {dimension_numbers = #tpu.dot_dimension_numbers<[1], [0], [0], [1], [0, 0, 1, 1], [], []>} : vector<8x128xbf16>, vector<128x128xbf16>, vector<8x128xf32> -> vector<8x128xf32>
    %c2 = arith.constant 2 : index
    %c0_14 = arith.constant 0 : index
    %20 = vector.load %arg9[%c2, %c0_14] : memref<6x128xf32, #tpu.memory_space<vmem>>, vector<1x128xf32>
    %21 = vector.broadcast %20 : vector<1x128xf32> to vector<8x128xf32>
    %22 = arith.addf %19, %21 : vector<8x128xf32>
    %c64_i32 = arith.constant 64 : i32
    %23 = tpu.dynamic_rotate %22 by %c64_i32 dim 1 : vector<8x128xf32>, i32 -> vector<8x128xf32>
    %c0_15 = arith.constant 0 : index
    %c0_16 = arith.constant 0 : index
    %24 = vector.load %arg2[%c0_15, %c0_16] : memref<8x128xf32, #tpu.memory_space<vmem>>, vector<8x128xf32>
    %25 = arith.mulf %23, %24 : vector<8x128xf32>
    %26 = arith.addf %22, %25 : vector<8x128xf32>
    %27 = arith.truncf %26 : vector<8x128xf32> to vector<8x128xbf16>
    %c0_17 = arith.constant 0 : index
    %c0_18 = arith.constant 0 : index
    %28 = vector.load %arg6[%c0_17, %c0_18] : memref<128x128xbf16, #tpu.memory_space<vmem>>, vector<128x128xbf16>
    %cst_19 = arith.constant dense<0.000000e+00> : vector<8x128xf32>
    %29 = tpu.matmul %27, %28, %cst_19 {dimension_numbers = #tpu.dot_dimension_numbers<[1], [0], [0], [1], [0, 0, 1, 1], [], []>} : vector<8x128xbf16>, vector<128x128xbf16>, vector<8x128xf32> -> vector<8x128xf32>
    %c3 = arith.constant 3 : index
    %c0_20 = arith.constant 0 : index
    %30 = vector.load %arg9[%c3, %c0_20] : memref<6x128xf32, #tpu.memory_space<vmem>>, vector<1x128xf32>
    %31 = vector.broadcast %30 : vector<1x128xf32> to vector<8x128xf32>
    %32 = arith.addf %29, %31 : vector<8x128xf32>
    %cst_21 = arith.constant 0.000000e+00 : f32
    %33 = vector.broadcast %cst_21 : f32 to vector<8x128xf32>
    %34 = arith.maximumf %32, %33 : vector<8x128xf32>
    %35 = arith.truncf %34 : vector<8x128xf32> to vector<8x128xbf16>
    %c0_22 = arith.constant 0 : index
    %c0_23 = arith.constant 0 : index
    %36 = vector.load %arg7[%c0_22, %c0_23] : memref<128x128xbf16, #tpu.memory_space<vmem>>, vector<128x128xbf16>
    %cst_24 = arith.constant dense<0.000000e+00> : vector<8x128xf32>
    %37 = tpu.matmul %35, %36, %cst_24 {dimension_numbers = #tpu.dot_dimension_numbers<[1], [0], [0], [1], [0, 0, 1, 1], [], []>} : vector<8x128xbf16>, vector<128x128xbf16>, vector<8x128xf32> -> vector<8x128xf32>
    %c4 = arith.constant 4 : index
    %c0_25 = arith.constant 0 : index
    %38 = vector.load %arg9[%c4, %c0_25] : memref<6x128xf32, #tpu.memory_space<vmem>>, vector<1x128xf32>
    %39 = vector.broadcast %38 : vector<1x128xf32> to vector<8x128xf32>
    %40 = arith.addf %37, %39 : vector<8x128xf32>
    %cst_26 = arith.constant 0.000000e+00 : f32
    %41 = vector.broadcast %cst_26 : f32 to vector<8x128xf32>
    %42 = arith.maximumf %40, %41 : vector<8x128xf32>
    %43 = arith.truncf %42 : vector<8x128xf32> to vector<8x128xbf16>
    %c0_27 = arith.constant 0 : index
    %c0_28 = arith.constant 0 : index
    %44 = vector.load %arg8[%c0_27, %c0_28] : memref<128x128xbf16, #tpu.memory_space<vmem>>, vector<128x128xbf16>
    %cst_29 = arith.constant dense<0.000000e+00> : vector<8x128xf32>
    %45 = tpu.matmul %43, %44, %cst_29 {dimension_numbers = #tpu.dot_dimension_numbers<[1], [0], [0], [1], [0, 0, 1, 1], [], []>} : vector<8x128xbf16>, vector<128x128xbf16>, vector<8x128xf32> -> vector<8x128xf32>
    %c5 = arith.constant 5 : index
    %c0_30 = arith.constant 0 : index
    %46 = vector.load %arg9[%c5, %c0_30] : memref<6x128xf32, #tpu.memory_space<vmem>>, vector<1x128xf32>
    %47 = vector.broadcast %46 : vector<1x128xf32> to vector<8x128xf32>
    %48 = arith.addf %45, %47 : vector<8x128xf32>
    %49 = arith.negf %48 : vector<8x128xf32>
    %50 = math.exp %49 : vector<8x128xf32>
    %cst_31 = arith.constant 1.000000e+00 : f32
    %51 = vector.broadcast %cst_31 : f32 to vector<8x128xf32>
    %52 = arith.addf %51, %50 : vector<8x128xf32>
    %53 = arith.divf %51, %52 : vector<8x128xf32>
    %c0_32 = arith.constant 0 : index
    %c0_33 = arith.constant 0 : index
    %54 = vector.load %arg10[%c0_32, %c0_33] : memref<8x128xf32, #tpu.memory_space<vmem>>, vector<8x128xf32>
    tpu.vector_store %arg10[%c0_32, %c0_33], %53 {strides = array<i32>} : memref<8x128xf32, #tpu.memory_space<vmem>>, vector<8x128xf32>,
    %c0_34 = arith.constant 0 : index
    %c0_35 = arith.constant 0 : index
    %55 = vector.load %arg11[%c0_34, %c0_35] : memref<8x128xf32, #tpu.memory_space<vmem>>, vector<8x128xf32>
    tpu.vector_store %arg11[%c0_34, %c0_35], %22 {strides = array<i32>} : memref<8x128xf32, #tpu.memory_space<vmem>>, vector<8x128xf32>,
    %c0_36 = arith.constant 0 : index
    %c0_37 = arith.constant 0 : index
    %56 = vector.load %arg12[%c0_36, %c0_37] : memref<8x128xf32, #tpu.memory_space<vmem>>, vector<8x128xf32>
    tpu.vector_store %arg12[%c0_36, %c0_37], %23 {strides = array<i32>} : memref<8x128xf32, #tpu.memory_space<vmem>>, vector<8x128xf32>,
    return
  }
  func.func @transform_0(%arg0: i32) -> (i32, i32) {
    %c0_i32 = arith.constant 0 : i32
    %c0_i32_0 = arith.constant 0 : i32
    return %arg0, %c0_i32 : i32, i32
  }
  func.func @transform_1(%arg0: i32) -> (i32, i32) {
    %c0_i32 = arith.constant 0 : i32
    %c0_i32_0 = arith.constant 0 : i32
    return %arg0, %c0_i32 : i32, i32
  }
  func.func @transform_2(%arg0: i32) -> (i32, i32) {
    %c0_i32 = arith.constant 0 : i32
    %c0_i32_0 = arith.constant 0 : i32
    %c0_i32_1 = arith.constant 0 : i32
    return %c0_i32, %c0_i32_0 : i32, i32
  }
  func.func @transform_3(%arg0: i32) -> (i32, i32) {
    %c0_i32 = arith.constant 0 : i32
    %c0_i32_0 = arith.constant 0 : i32
    %c0_i32_1 = arith.constant 0 : i32
    return %c0_i32, %c0_i32_0 : i32, i32
  }
  func.func @transform_4(%arg0: i32) -> (i32, i32) {
    %c0_i32 = arith.constant 0 : i32
    %c0_i32_0 = arith.constant 0 : i32
    %c0_i32_1 = arith.constant 0 : i32
    return %c0_i32, %c0_i32_0 : i32, i32
  }
  func.func @transform_5(%arg0: i32) -> (i32, i32) {
    %c0_i32 = arith.constant 0 : i32
    %c0_i32_0 = arith.constant 0 : i32
    %c0_i32_1 = arith.constant 0 : i32
    return %c0_i32, %c0_i32_0 : i32, i32
  }
  func.func @transform_6(%arg0: i32) -> (i32, i32) {
    %c0_i32 = arith.constant 0 : i32
    %c0_i32_0 = arith.constant 0 : i32
    %c0_i32_1 = arith.constant 0 : i32
    return %c0_i32, %c0_i32_0 : i32, i32
  }
  func.func @transform_7(%arg0: i32) -> (i32, i32) {
    %c0_i32 = arith.constant 0 : i32
    %c0_i32_0 = arith.constant 0 : i32
    %c0_i32_1 = arith.constant 0 : i32
    return %c0_i32, %c0_i32_0 : i32, i32
  }
  func.func @transform_8(%arg0: i32) -> (i32, i32) {
    %c0_i32 = arith.constant 0 : i32
    %c0_i32_0 = arith.constant 0 : i32
    %c0_i32_1 = arith.constant 0 : i32
    return %c0_i32, %c0_i32_0 : i32, i32
  }
  func.func @transform_9(%arg0: i32) -> (i32, i32) {
    %c0_i32 = arith.constant 0 : i32
    %c0_i32_0 = arith.constant 0 : i32
    return %arg0, %c0_i32 : i32, i32
  }
  func.func @transform_10(%arg0: i32) -> (i32, i32) {
    %c0_i32 = arith.constant 0 : i32
    %c0_i32_0 = arith.constant 0 : i32
    return %arg0, %c0_i32 : i32, i32
  }
  func.func @transform_11(%arg0: i32) -> (i32, i32) {
    %c0_i32 = arith.constant 0 : i32
    %c0_i32_0 = arith.constant 0 : i32
    return %arg0, %c0_i32 : i32, i32
  }
}

module attributes {stable_mosaic.version = 11 : i64} {
  func.func @_ff_fused_kernel(%arg0: i32, %arg1: memref<8x128xf32, #tpu.memory_space<vmem>>, %arg2: memref<8x128xf32, #tpu.memory_space<vmem>>, %arg3: memref<128x128xbf16, #tpu.memory_space<vmem>>, %arg4: memref<128x128xbf16, #tpu.memory_space<vmem>>, %arg5: memref<128x128xbf16, #tpu.memory_space<vmem>>, %arg6: memref<128x128xbf16, #tpu.memory_space<vmem>>, %arg7: memref<128x128xbf16, #tpu.memory_space<vmem>>, %arg8: memref<128x128xbf16, #tpu.memory_space<vmem>>, %arg9: memref<6x128xf32, #tpu.memory_space<vmem>>, %arg10: memref<8x128xf32, #tpu.memory_space<vmem>>, %arg11: memref<8x128xf32, #tpu.memory_space<vmem>>, %arg12: memref<8x128xf32, #tpu.memory_space<vmem>>) attributes {dimension_semantics = [#tpu.dimension_semantics<parallel>], iteration_bounds = array<i64: 1>, scalar_prefetch = 0 : i64, scratch_operands = 0 : i64, tpu.core_type = #tpu.core_type<tc>, window_params = [{transform_indices = @transform_0, window_bounds = array<i64: 8, 128>}, {transform_indices = @transform_1, window_bounds = array<i64: 8, 128>}, {pipeline_mode = #tpu.pipeline_mode<synchronous>, transform_indices = @transform_2, window_bounds = array<i64: 128, 128>}, {pipeline_mode = #tpu.pipeline_mode<synchronous>, transform_indices = @transform_3, window_bounds = array<i64: 128, 128>}, {pipeline_mode = #tpu.pipeline_mode<synchronous>, transform_indices = @transform_4, window_bounds = array<i64: 128, 128>}, {pipeline_mode = #tpu.pipeline_mode<synchronous>, transform_indices = @transform_5, window_bounds = array<i64: 128, 128>}, {pipeline_mode = #tpu.pipeline_mode<synchronous>, transform_indices = @transform_6, window_bounds = array<i64: 128, 128>}, {pipeline_mode = #tpu.pipeline_mode<synchronous>, transform_indices = @transform_7, window_bounds = array<i64: 128, 128>}, {pipeline_mode = #tpu.pipeline_mode<synchronous>, transform_indices = @transform_8, window_bounds = array<i64: 6, 128>}, {transform_indices = @transform_9, window_bounds = array<i64: 8, 128>}, {transform_indices = @transform_10, window_bounds = array<i64: 8, 128>}, {transform_indices = @transform_11, window_bounds = array<i64: 8, 128>}]} {
    %c0 = arith.constant 0 : index
    %c0_0 = arith.constant 0 : index
    %0 = vector.load %arg1[%c0, %c0_0] : memref<8x128xf32, #tpu.memory_space<vmem>>, vector<8x128xf32>
    %1 = arith.truncf %0 : vector<8x128xf32> to vector<8x128xbf16>
    %c0_1 = arith.constant 0 : index
    %c0_2 = arith.constant 0 : index
    %2 = vector.load %arg3[%c0_1, %c0_2] : memref<128x128xbf16, #tpu.memory_space<vmem>>, vector<128x128xbf16>
    %cst = arith.constant dense<0.000000e+00> : vector<8x128xf32>
    %3 = tpu.matmul %1, %2, %cst {dimension_numbers = #tpu.dot_dimension_numbers<[1], [0], [0], [1], [0, 0, 1, 1], [], []>} : vector<8x128xbf16>, vector<128x128xbf16>, vector<8x128xf32> -> vector<8x128xf32>
    %c0_3 = arith.constant 0 : index
    %c0_4 = arith.constant 0 : index
    %4 = vector.load %arg9[%c0_3, %c0_4] : memref<6x128xf32, #tpu.memory_space<vmem>>, vector<1x128xf32>
    %5 = vector.broadcast %4 : vector<1x128xf32> to vector<8x128xf32>
    %6 = arith.addf %3, %5 : vector<8x128xf32>
    %cst_5 = arith.constant 0.000000e+00 : f32
    %7 = vector.broadcast %cst_5 : f32 to vector<8x128xf32>
    %8 = arith.maximumf %6, %7 : vector<8x128xf32>
    %9 = arith.truncf %8 : vector<8x128xf32> to vector<8x128xbf16>
    %c0_6 = arith.constant 0 : index
    %c0_7 = arith.constant 0 : index
    %10 = vector.load %arg4[%c0_6, %c0_7] : memref<128x128xbf16, #tpu.memory_space<vmem>>, vector<128x128xbf16>
    %cst_8 = arith.constant dense<0.000000e+00> : vector<8x128xf32>
    %11 = tpu.matmul %9, %10, %cst_8 {dimension_numbers = #tpu.dot_dimension_numbers<[1], [0], [0], [1], [0, 0, 1, 1], [], []>} : vector<8x128xbf16>, vector<128x128xbf16>, vector<8x128xf32> -> vector<8x128xf32>
    %c1 = arith.constant 1 : index
    %c0_9 = arith.constant 0 : index
    %12 = vector.load %arg9[%c1, %c0_9] : memref<6x128xf32, #tpu.memory_space<vmem>>, vector<1x128xf32>
    %13 = vector.broadcast %12 : vector<1x128xf32> to vector<8x128xf32>
    %14 = arith.addf %11, %13 : vector<8x128xf32>
    %cst_10 = arith.constant 0.000000e+00 : f32
    %15 = vector.broadcast %cst_10 : f32 to vector<8x128xf32>
    %16 = arith.maximumf %14, %15 : vector<8x128xf32>
    %17 = arith.truncf %16 : vector<8x128xf32> to vector<8x128xbf16>
    %c0_11 = arith.constant 0 : index
    %c0_12 = arith.constant 0 : index
    %18 = vector.load %arg5[%c0_11, %c0_12] : memref<128x128xbf16, #tpu.memory_space<vmem>>, vector<128x128xbf16>
    %cst_13 = arith.constant dense<0.000000e+00> : vector<8x128xf32>
    %19 = tpu.matmul %17, %18, %cst_13 {dimension_numbers = #tpu.dot_dimension_numbers<[1], [0], [0], [1], [0, 0, 1, 1], [], []>} : vector<8x128xbf16>, vector<128x128xbf16>, vector<8x128xf32> -> vector<8x128xf32>
    %c2 = arith.constant 2 : index
    %c0_14 = arith.constant 0 : index
    %20 = vector.load %arg9[%c2, %c0_14] : memref<6x128xf32, #tpu.memory_space<vmem>>, vector<1x128xf32>
    %21 = vector.broadcast %20 : vector<1x128xf32> to vector<8x128xf32>
    %22 = arith.addf %19, %21 : vector<8x128xf32>
    %c64_i32 = arith.constant 64 : i32
    %23 = tpu.dynamic_rotate %22 by %c64_i32 dim 1 : vector<8x128xf32>, i32 -> vector<8x128xf32>
    %c0_15 = arith.constant 0 : index
    %c0_16 = arith.constant 0 : index
    %24 = vector.load %arg2[%c0_15, %c0_16] : memref<8x128xf32, #tpu.memory_space<vmem>>, vector<8x128xf32>
    %25 = arith.mulf %23, %24 : vector<8x128xf32>
    %26 = arith.addf %22, %25 : vector<8x128xf32>
    %27 = arith.truncf %26 : vector<8x128xf32> to vector<8x128xbf16>
    %c0_17 = arith.constant 0 : index
    %c0_18 = arith.constant 0 : index
    %28 = vector.load %arg6[%c0_17, %c0_18] : memref<128x128xbf16, #tpu.memory_space<vmem>>, vector<128x128xbf16>
    %cst_19 = arith.constant dense<0.000000e+00> : vector<8x128xf32>
    %29 = tpu.matmul %27, %28, %cst_19 {dimension_numbers = #tpu.dot_dimension_numbers<[1], [0], [0], [1], [0, 0, 1, 1], [], []>} : vector<8x128xbf16>, vector<128x128xbf16>, vector<8x128xf32> -> vector<8x128xf32>
    %c3 = arith.constant 3 : index
    %c0_20 = arith.constant 0 : index
    %30 = vector.load %arg9[%c3, %c0_20] : memref<6x128xf32, #tpu.memory_space<vmem>>, vector<1x128xf32>
    %31 = vector.broadcast %30 : vector<1x128xf32> to vector<8x128xf32>
    %32 = arith.addf %29, %31 : vector<8x128xf32>
    %cst_21 = arith.constant 0.000000e+00 : f32
    %33 = vector.broadcast %cst_21 : f32 to vector<8x128xf32>
    %34 = arith.maximumf %32, %33 : vector<8x128xf32>
    %35 = arith.truncf %34 : vector<8x128xf32> to vector<8x128xbf16>
    %c0_22 = arith.constant 0 : index
    %c0_23 = arith.constant 0 : index
    %36 = vector.load %arg7[%c0_22, %c0_23] : memref<128x128xbf16, #tpu.memory_space<vmem>>, vector<128x128xbf16>
    %cst_24 = arith.constant dense<0.000000e+00> : vector<8x128xf32>
    %37 = tpu.matmul %35, %36, %cst_24 {dimension_numbers = #tpu.dot_dimension_numbers<[1], [0], [0], [1], [0, 0, 1, 1], [], []>} : vector<8x128xbf16>, vector<128x128xbf16>, vector<8x128xf32> -> vector<8x128xf32>
    %c4 = arith.constant 4 : index
    %c0_25 = arith.constant 0 : index
    %38 = vector.load %arg9[%c4, %c0_25] : memref<6x128xf32, #tpu.memory_space<vmem>>, vector<1x128xf32>
    %39 = vector.broadcast %38 : vector<1x128xf32> to vector<8x128xf32>
    %40 = arith.addf %37, %39 : vector<8x128xf32>
    %cst_26 = arith.constant 0.000000e+00 : f32
    %41 = vector.broadcast %cst_26 : f32 to vector<8x128xf32>
    %42 = arith.maximumf %40, %41 : vector<8x128xf32>
    %43 = arith.truncf %42 : vector<8x128xf32> to vector<8x128xbf16>
    %c0_27 = arith.constant 0 : index
    %c0_28 = arith.constant 0 : index
    %44 = vector.load %arg8[%c0_27, %c0_28] : memref<128x128xbf16, #tpu.memory_space<vmem>>, vector<128x128xbf16>
    %cst_29 = arith.constant dense<0.000000e+00> : vector<8x128xf32>
    %45 = tpu.matmul %43, %44, %cst_29 {dimension_numbers = #tpu.dot_dimension_numbers<[1], [0], [0], [1], [0, 0, 1, 1], [], []>} : vector<8x128xbf16>, vector<128x128xbf16>, vector<8x128xf32> -> vector<8x128xf32>
    %c5 = arith.constant 5 : index
    %c0_30 = arith.constant 0 : index
    %46 = vector.load %arg9[%c5, %c0_30] : memref<6x128xf32, #tpu.memory_space<vmem>>, vector<1x128xf32>
    %47 = vector.broadcast %46 : vector<1x128xf32> to vector<8x128xf32>
    %48 = arith.addf %45, %47 : vector<8x128xf32>
    %49 = arith.negf %48 : vector<8x128xf32>
    %50 = math.exp %49 : vector<8x128xf32>
    %cst_31 = arith.constant 1.000000e+00 : f32
    %51 = vector.broadcast %cst_31 : f32 to vector<8x128xf32>
    %52 = arith.addf %51, %50 : vector<8x128xf32>
    %53 = arith.divf %51, %52 : vector<8x128xf32>
    %c0_32 = arith.constant 0 : index
    %c0_33 = arith.constant 0 : index
    %54 = vector.load %arg10[%c0_32, %c0_33] : memref<8x128xf32, #tpu.memory_space<vmem>>, vector<8x128xf32>
    tpu.vector_store %arg10[%c0_32, %c0_33], %53 {strides = array<i32>} : memref<8x128xf32, #tpu.memory_space<vmem>>, vector<8x128xf32>,
    %c0_34 = arith.constant 0 : index
    %c0_35 = arith.constant 0 : index
    %55 = vector.load %arg11[%c0_34, %c0_35] : memref<8x128xf32, #tpu.memory_space<vmem>>, vector<8x128xf32>
    tpu.vector_store %arg11[%c0_34, %c0_35], %22 {strides = array<i32>} : memref<8x128xf32, #tpu.memory_space<vmem>>, vector<8x128xf32>,
    %c0_36 = arith.constant 0 : index
    %c0_37 = arith.constant 0 : index
    %56 = vector.load %arg12[%c0_36, %c0_37] : memref<8x128xf32, #tpu.memory_space<vmem>>, vector<8x128xf32>
    tpu.vector_store %arg12[%c0_36, %c0_37], %23 {strides = array<i32>} : memref<8x128xf32, #tpu.memory_space<vmem>>, vector<8x128xf32>,
    return
  }
  func.func @transform_0(%arg0: i32) -> (i32, i32) {
    %c0_i32 = arith.constant 0 : i32
    %c0_i32_0 = arith.constant 0 : i32
    return %arg0, %c0_i32 : i32, i32
  }
  func.func @transform_1(%arg0: i32) -> (i32, i32) {
    %c0_i32 = arith.constant 0 : i32
    %c0_i32_0 = arith.constant 0 : i32
    return %arg0, %c0_i32 : i32, i32
  }
  func.func @transform_2(%arg0: i32) -> (i32, i32) {
    %c0_i32 = arith.constant 0 : i32
    %c0_i32_0 = arith.constant 0 : i32
    %c0_i32_1 = arith.constant 0 : i32
    return %c0_i32, %c0_i32_0 : i32, i32
  }
  func.func @transform_3(%arg0: i32) -> (i32, i32) {
    %c0_i32 = arith.constant 0 : i32
    %c0_i32_0 = arith.constant 0 : i32
    %c0_i32_1 = arith.constant 0 : i32
    return %c0_i32, %c0_i32_0 : i32, i32
  }
  func.func @transform_4(%arg0: i32) -> (i32, i32) {
    %c0_i32 = arith.constant 0 : i32
    %c0_i32_0 = arith.constant 0 : i32
    %c0_i32_1 = arith.constant 0 : i32
    return %c0_i32, %c0_i32_0 : i32, i32
  }
  func.func @transform_5(%arg0: i32) -> (i32, i32) {
    %c0_i32 = arith.constant 0 : i32
    %c0_i32_0 = arith.constant 0 : i32
    %c0_i32_1 = arith.constant 0 : i32
    return %c0_i32, %c0_i32_0 : i32, i32
  }
  func.func @transform_6(%arg0: i32) -> (i32, i32) {
    %c0_i32 = arith.constant 0 : i32
    %c0_i32_0 = arith.constant 0 : i32
    %c0_i32_1 = arith.constant 0 : i32
    return %c0_i32, %c0_i32_0 : i32, i32
  }
  func.func @transform_7(%arg0: i32) -> (i32, i32) {
    %c0_i32 = arith.constant 0 : i32
    %c0_i32_0 = arith.constant 0 : i32
    %c0_i32_1 = arith.constant 0 : i32
    return %c0_i32, %c0_i32_0 : i32, i32
  }
  func.func @transform_8(%arg0: i32) -> (i32, i32) {
    %c0_i32 = arith.constant 0 : i32
    %c0_i32_0 = arith.constant 0 : i32
    %c0_i32_1 = arith.constant 0 : i32
    return %c0_i32, %c0_i32_0 : i32, i32
  }
  func.func @transform_9(%arg0: i32) -> (i32, i32) {
    %c0_i32 = arith.constant 0 : i32
    %c0_i32_0 = arith.constant 0 : i32
    return %arg0, %c0_i32 : i32, i32
  }
  func.func @transform_10(%arg0: i32) -> (i32, i32) {
    %c0_i32 = arith.constant 0 : i32
    %c0_i32_0 = arith.constant 0 : i32
    return %arg0, %c0_i32 : i32, i32
  }
  func.func @transform_11(%arg0: i32) -> (i32, i32) {
    %c0_i32 = arith.constant 0 : i32
    %c0_i32_0 = arith.constant 0 : i32
    return %arg0, %c0_i32 : i32, i32
  }
}

</mosaic_0001>

<bundles_post_ra>
// kernel: tpu_custom_call.1
= control target key start
LH: loop header
LB: loop body
LE: loop exit
PB: predicated region body
PF: predicated region fallthrough
CT: control target
= control target key end

     0   :  { %17 = vsyncpa [#allocation3], 0  ;;  %s1603_s0 = inlined_call_operand.hbm [shape: f32[8,128], index: 0, kind: input, shape index: {}]   ;;  %s1604_s1 = inlined_call_operand.hbm [shape: f32[8,128], index: 1, kind: input, shape index: {}]   ;;  %s1605_s2 = inlined_call_operand.hbm [shape: bf16[128,128], index: 2, kind: input, shape index: {}]   ;;  %s1606_s3 = inlined_call_operand.hbm [shape: bf16[128,128], index: 3, kind: input, shape index: {}]   ;;  %s1607_s4 = inlined_call_operand.hbm [shape: bf16[128,128], index: 4, kind: input, shape index: {}]   ;;  %s1608_s5 = inlined_call_operand.hbm [shape: bf16[128,128], index: 5, kind: input, shape index: {}]   ;;  %s1609_s6 = inlined_call_operand.hbm [shape: bf16[128,128], index: 6, kind: input, shape index: {}]   ;;  %s1610_s7 = inlined_call_operand.hbm [shape: bf16[128,128], index: 7, kind: input, shape index: {}]   ;;  %s1611_s8 = inlined_call_operand.vmem [shape: f32[6,128], index: 8, kind: input, shape index: {}]   ;;  %s1612_s9 = inlined_call_operand.hbm [shape: f32[8,128], index: 9, kind: output, shape index: {0}]   ;;  %s1613_s10 = inlined_call_operand.hbm [shape: f32[8,128], index: 10, kind: output, shape index: {1}]   ;;  %s1614_s11 = inlined_call_operand.hbm [shape: f32[8,128], index: 11, kind: output, shape index: {2}]  }
   0x1   :  { %18 = vsyncpa [#allocation6], 0 }
   0x2   :  { %19 = vsyncpa [#allocation9], 0 }
   0x3   :  { %20 = vsyncpa [#allocation12], 0 }
   0x4   :  { %21 = vsyncpa [#allocation15], 0 }
   0x5   :  { %22 = vsyncpa [#allocation4], 0 }
   0x6   :  { %23 = vsyncpa [#allocation18], 0  ;;  %s1398_s17 = smov [#allocation5]  }
   0x7   :  { %s40_s18 = sshll.u32 %s1398_s17, 4  ;;  %s41_s18 = int_to_ptr.vmem [resolvable:$true] %s40_s18 }
   0x8   :  { %s1172_s19 = scalar_lea.vmem %s41_s18, 128  ;;  %p1177_p1 = scmp.lt.s32.totalorder %s41_s18, %s41_s18 }
   0x9   :  { %p1173_p0 = scmp.ne.s32.totalorder %s41_s18, %s1172_s19  ;;  %p1178_p2 = scmp.lt.s32.totalorder %s1172_s19, %s1172_s19 }
   0xb   :  { %p1179_p3 = por %p1178_p2, %p1177_p1 }
   0xd   :  { %p1180_p4 = pnand %p1179_p3, %p1173_p0 }
   0xf   :  { %1183 = shalt.err (!%p1180_p4)
}
  0x10   :  { %43 = dma.hbm_to_vmem [thread:$0]  %s1604_s1, 128, %s41_s18, [#allocation6]  }
  0x11   :  { %s1399_s22 = smov [#allocation8]   ;;  %s1400_s24 = smov [#allocation11]  }
  0x12   :  { %s61_s23 = sshll.u32 %s1399_s22, 4  ;;  %s85_s25 = sshll.u32 %s1400_s24, 4  ;;  %s62_s23 = int_to_ptr.vmem [resolvable:$true] %s61_s23  ;;  %s86_s25 = int_to_ptr.vmem [resolvable:$true] %s85_s25 }
  0x13   :  { %s1192_s26 = scalar_lea.vmem %s62_s23, 1024  ;;  %p1197_p6 = scmp.lt.s32.totalorder %s62_s23, %s62_s23 }
  0x14   :  { %p1193_p5 = scmp.ne.s32.totalorder %s62_s23, %s1192_s26  ;;  %p1198_p7 = scmp.lt.s32.totalorder %s1192_s26, %s1192_s26 }
  0x16   :  { %p1199_p8 = por %p1198_p7, %p1197_p6 }
  0x18   :  { %p1200_p9 = pnand %p1199_p8, %p1193_p5 }
  0x1a   :  { %1203 = shalt.err (!%p1200_p9)
}
  0x1b   :  { %s1401_s27 = smov 64   ;;  %s1402_s28 = smov 4  }
  0x1c   :  { %67 = dma.hbm_to_vmem [thread:$0]  %s1606_s3, 1024, %s62_s23, [#allocation9], %s1401_s27, %s1401_s27, %s1402_s28  }
  0x1d   :  { %s1212_s1 = scalar_lea.vmem %s86_s25, 1024  ;;  %p1217_p11 = scmp.lt.s32.totalorder %s86_s25, %s86_s25 }
  0x1e   :  { %p1213_p10 = scmp.ne.s32.totalorder %s86_s25, %s1212_s1  ;;  %p1218_p12 = scmp.lt.s32.totalorder %s1212_s1, %s1212_s1 }
  0x20   :  { %p1219_p13 = por %p1218_p12, %p1217_p11 }
  0x22   :  { %p1220_p0 = pnand %p1219_p13, %p1213_p10 }
  0x24   :  { %1223 = shalt.err (!%p1220_p0)
}
  0x25   :  { %91 = dma.hbm_to_vmem [thread:$0]  %s1608_s5, 1024, %s86_s25, [#allocation12], %s1401_s27, %s1401_s27, %s1402_s28  }
  0x26   :  { %s1403_s14 = smov [#allocation2]   ;;  %s1404_s16 = smov [#allocation7]  }
  0x27   :  { %s30_s15 = sshll.u32 %s1403_s14, 4  ;;  %s49_s3 = sshll.u32 %s1404_s16, 4  ;;  %s31_s15 = int_to_ptr.vmem [resolvable:$true] %s30_s15  ;;  %s50_s3 = int_to_ptr.vmem [resolvable:$true] %s49_s3 }
  0x28   :  { %s1232_s17 = scalar_lea.vmem %s31_s15, 128  ;;  %p1237_p2 = scmp.lt.s32.totalorder %s31_s15, %s31_s15 }
  0x29   :  { %p1233_p1 = scmp.ne.s32.totalorder %s31_s15, %s1232_s17  ;;  %p1238_p3 = scmp.lt.s32.totalorder %s1232_s17, %s1232_s17 }
  0x2b   :  { %p1239_p4 = por %p1238_p3, %p1237_p2 }
  0x2d   :  { %p1240_p5 = pnand %p1239_p4, %p1233_p1 }
  0x2f   :  { %1243 = shalt.err (!%p1240_p5)
}
  0x30   :  { %33 = dma.hbm_to_vmem [thread:$0]  %s1603_s0, 128, %s31_s15, [#allocation3]  }
  0x31   :  { %s1252_s20 = scalar_lea.vmem %s50_s3, 1024  ;;  %p1257_p7 = scmp.lt.s32.totalorder %s50_s3, %s50_s3 }
  0x32   :  { %p1253_p6 = scmp.ne.s32.totalorder %s50_s3, %s1252_s20  ;;  %p1258_p8 = scmp.lt.s32.totalorder %s1252_s20, %s1252_s20 }
  0x34   :  { %p1259_p9 = por %p1258_p8, %p1257_p7 }
  0x36   :  { %p1260_p10 = pnand %p1259_p9, %p1253_p6 }
  0x38   :  { %1263 = shalt.err (!%p1260_p10)
}
  0x39   :  { %55 = dma.hbm_to_vmem [thread:$0]  %s1605_s2, 1024, %s50_s3, [#allocation6], %s1401_s27, %s1401_s27, %s1402_s28  }
  0x3a   :  { %s1405_s22 = smov [#allocation10]   ;;  %s1406_s24 = smov [#allocation13]  }
  0x3b   :  { %s73_s23 = sshll.u32 %s1405_s22, 4  ;;  %s97_s0 = sshll.u32 %s1406_s24, 4  ;;  %s74_s23 = int_to_ptr.vmem [resolvable:$true] %s73_s23  ;;  %s98_s0 = int_to_ptr.vmem [resolvable:$true] %s97_s0 }
  0x3c   :  { %s1272_s25 = scalar_lea.vmem %s74_s23, 1024  ;;  %p1277_p12 = scmp.lt.s32.totalorder %s74_s23, %s74_s23 }
  0x3d   :  { %p1273_p11 = scmp.ne.s32.totalorder %s74_s23, %s1272_s25  ;;  %p1278_p13 = scmp.lt.s32.totalorder %s1272_s25, %s1272_s25 }
  0x3f   :  { %p1279_p0 = por %p1278_p13, %p1277_p12 }
  0x41   :  { %p1280_p1 = pnand %p1279_p0, %p1273_p11 }
  0x43   :  { %1283 = shalt.err (!%p1280_p1)
}
  0x44   :  { %79 = dma.hbm_to_vmem [thread:$0]  %s1607_s4, 1024, %s74_s23, [#allocation9], %s1401_s27, %s1401_s27, %s1402_s28  }
  0x45   :  { %s1292_s2 = scalar_lea.vmem %s98_s0, 1024  ;;  %p1297_p3 = scmp.lt.s32.totalorder %s98_s0, %s98_s0 }
  0x46   :  { %p1293_p2 = scmp.ne.s32.totalorder %s98_s0, %s1292_s2  ;;  %p1298_p4 = scmp.lt.s32.totalorder %s1292_s2, %s1292_s2 }
  0x48   :  { %p1299_p5 = por %p1298_p4, %p1297_p3 }
  0x4a   :  { %p1300_p6 = pnand %p1299_p5, %p1293_p2 }
  0x4c   :  { %1303 = shalt.err (!%p1300_p6)
}
  0x4d   :  { %103 = dma.hbm_to_vmem [thread:$0]  %s1609_s6, 1024, %s98_s0, [#allocation12], %s1401_s27, %s1401_s27, %s1402_s28  }
  0x4e   :  { %s1407_s12 = smov [#allocation14]  }
  0x4f   :  { %s109_s13 = sshll.u32 %s1407_s12, 4  ;;  %s110_s13 = int_to_ptr.vmem [resolvable:$true] %s109_s13 }
  0x50   :  { %s1312_s14 = scalar_lea.vmem %s110_s13, 1024  ;;  %p1317_p8 = scmp.lt.s32.totalorder %s110_s13, %s110_s13 }
  0x51   :  { %p1313_p7 = scmp.ne.s32.totalorder %s110_s13, %s1312_s14  ;;  %p1318_p9 = scmp.lt.s32.totalorder %s1312_s14, %s1312_s14 }
  0x53   :  { %p1319_p10 = por %p1318_p9, %p1317_p8 }
  0x55   :  { %p1320_p11 = pnand %p1319_p10, %p1313_p7 }
  0x57   :  { %1323 = shalt.err (!%p1320_p11)
}
  0x58   :  { %115 = dma.hbm_to_vmem [thread:$0]  %s1610_s7, 1024, %s110_s13, [#allocation15], %s1401_s27, %s1401_s27, %s1402_s28  }
  0x59   :  { %1384 = dma.done.wait [#allocation3], 128  }
  0x5a   :  { %1385 = vsyncadd [#allocation3], 4294967168 }
  0x5b   :  { %1386 = dma.done.wait [#allocation6], 1152  }
  0x5c   :  { %1387 = vsyncadd [#allocation6], 4294966144 }
  0x5d   :  { %1388 = dma.done.wait [#allocation9], 2048  }
  0x5e   :  { %1389 = vsyncadd [#allocation9], 4294965248 }
  0x5f   :  { %1390 = dma.done.wait [#allocation12], 2048  }
  0x60   :  { %1391 = vsyncadd [#allocation12], 4294965248 }
  0x61   :  { %1392 = dma.done.wait [#allocation15], 1024  }
  0x62   :  { %1393 = vsyncadd [#allocation15], 4294966272  ;;  %v1408_v0 = vmov 0.0   ;;  %vm1409_vm0 = vmmov 0   ;;  %v1112_v1 = vld [vmem:[#allocation7 + $0x38] sm:$0xff]   ;;  %v1113_v2 = vld [vmem:[#allocation7 + $0x30] sm:$0xff]  }
  0x63   :  { %977 = vmatprep.subr.bf16.mxu0 %v1408_v0  ;;  %993 = vmatprep.mubr.msk.bf16.mxu0 %vm1409_vm0, %v1408_v0  ;;  %v1114_v3 = vld [vmem:[#allocation7 + $0x28] sm:$0xff]   ;;  %v1120_v4 = vld [vmem:[#allocation8 + $0x38] sm:$0xff]   ;;  %v1115_v5 = vld [vmem:[#allocation7 + $0x20] sm:$0xff]   ;;  %s1410_s5 = smov [#allocation17]  }
  0x64   :  { %997 = vmatprep.subr.bf16.mxu1 %v1408_v0  ;;  %1013 = vmatprep.mubr.msk.bf16.mxu1 %vm1409_vm0, %v1408_v0  ;;  %v1121_v6 = vld [vmem:[#allocation8 + $0x30] sm:$0xff]   ;;  %v1116_v7 = vld [vmem:[#allocation7 + $0x18] sm:$0xff]   ;;  %v1122_v8 = vld [vmem:[#allocation8 + $0x28] sm:$0xff]   ;;  %s838_s21 = sshll.u32 %s1410_s5, 4  ;;  %s839_s21 = int_to_ptr.vmem [resolvable:$true] %s838_s21 }
  0x65   :  { %978 = vmatpush3.bf16.msra.mxu0 %v1112_v1  ;;  %998 = vmatpush3.bf16.msra.mxu1 %v1120_v4  ;;  %v1117_v9 = vld [vmem:[#allocation7 + $0x10] sm:$0xff]   ;;  %v1123_v10 = vld [vmem:[#allocation8 + $0x20] sm:$0xff]   ;;  %v1118_v11 = vld [vmem:[#allocation7 + $0x8] sm:$0xff]   ;;  %s1324_s22 = scalar_lea.vmem %s839_s21, 128  ;;  %p1329_p13 = scmp.lt.s32.totalorder %s839_s21, %s839_s21 }
  0x66   :  { %979 = vmatprep.subr.bf16.mxu0 %v1408_v0  ;;  %999 = vmatprep.subr.bf16.mxu1 %v1408_v0  ;;  %v1124_v12 = vld [vmem:[#allocation8 + $0x18] sm:$0xff]   ;;  %v1119_v13 = vld [vmem:[#allocation7] sm:$0xff]   ;;  %v143_v14 = vld [vmem:[#allocation2] sm:$0xff]  ;;  %p1325_p12 = scmp.ne.s32.totalorder %s839_s21, %s1324_s22  ;;  %p1330_p0 = scmp.lt.s32.totalorder %s1324_s22, %s1324_s22 }
  0x67   :  { %v1125_v15 = vld [vmem:[#allocation8 + $0x10] sm:$0xff]   ;;  %v144_v16 = vpack.c.bf16 %v143_v14, %v143_v14  ;;  %v1126_v17 = vld [vmem:[#allocation8 + $0x8] sm:$0xff]   ;;  %v1127_v18 = vld [vmem:[#allocation8] sm:$0xff]  }
  0x68   :  { %v1128_v19 = vld [vmem:[#allocation10 + $0x38] sm:$0xff]   ;;  %v1129_v20 = vld [vmem:[#allocation10 + $0x30] sm:$0xff]   ;;  %v1130_v21 = vld [vmem:[#allocation10 + $0x28] sm:$0xff]   ;;  %p1331_p1 = por %p1330_p0, %p1329_p13 }
  0x69   :  { %980 = vmatpush3.bf16.msra.mxu0 %v1113_v2  ;;  %1000 = vmatpush3.bf16.msra.mxu1 %v1121_v6  ;;  %v1131_v22 = vld [vmem:[#allocation10 + $0x20] sm:$0xff]   ;;  %v1132_v23 = vld [vmem:[#allocation10 + $0x18] sm:$0xff]   ;;  %v1133_v24 = vld [vmem:[#allocation10 + $0x10] sm:$0xff]  }
  0x6a   :  { %981 = vmatprep.subr.bf16.mxu0 %v1408_v0  ;;  %1001 = vmatprep.subr.bf16.mxu1 %v1408_v0  ;;  %v868_v25 = vld [vmem:[%s1611_s8] ss:$0 sm:$0xff]  ;;  %v1134_v33 = vld [vmem:[#allocation10 + $0x8] sm:$0xff]   ;;  %v1135_v34 = vld [vmem:[#allocation10] sm:$0xff]   ;;  %p1332_p2 = pnand %p1331_p1, %p1325_p12 }
  0x6b   :  { %v877_v35 = vld [vmem:[%s1611_s8 + $0x1] ss:$0 sm:$0xff]  ;;  %v1136_v43 = vld [vmem:[#allocation11 + $0x38] sm:$0xff]   ;;  %v1138_v45 = vld [vmem:[#allocation11 + $0x28] sm:$0xff]  }
  0x6c   :  { %v1137_v44 = vld [vmem:[#allocation11 + $0x30] sm:$0xff]   ;;  %v1139_v46 = vld [vmem:[#allocation11 + $0x20] sm:$0xff]   ;;  %v1140_v47 = vld [vmem:[#allocation11 + $0x18] sm:$0xff]  }
  0x6d   :  { %982 = vmatpush3.bf16.msra.mxu0 %v1114_v3  ;;  %1002 = vmatpush3.bf16.msra.mxu1 %v1122_v8  ;;  %v1141_v48 = vld [vmem:[#allocation11 + $0x10] sm:$0xff]   ;;  %v1142_v49 = vld [vmem:[#allocation11 + $0x8] sm:$0xff]   ;;  %v1143_v50 = vld [vmem:[#allocation11] sm:$0xff]  }
  0x6e   :  { %983 = vmatprep.subr.bf16.mxu0 %v1408_v0  ;;  %1003 = vmatprep.subr.bf16.mxu1 %v1408_v0  ;;  %v1144_v51 = vld [vmem:[#allocation13 + $0x38] sm:$0xff]   ;;  %v886_v52 = vld [vmem:[%s1611_s8 + $0x2] ss:$0 sm:$0xff]  ;;  %v1146_v57 = vld [vmem:[#allocation13 + $0x28] sm:$0xff]  }
  0x6f   :  { %v1145_v53 = vld [vmem:[#allocation13 + $0x30] sm:$0xff]   ;;  %v1147_v60 = vld [vmem:[#allocation13 + $0x20] sm:$0xff]   ;;  %v1148_v61 = vld [vmem:[#allocation13 + $0x18] sm:$0xff]  }
  0x70   :  { %v1149_v62 = vld [vmem:[#allocation13 + $0x10] sm:$0xff]   ;;  %v478_v63 = vld [vmem:[#allocation5] sm:$0xff]  ;;  %v1151_v6 = vld [vmem:[#allocation13] sm:$0xff]  }
  0x71   :  { %984 = vmatpush3.bf16.msra.mxu0 %v1115_v5  ;;  %1004 = vmatpush3.bf16.msra.mxu1 %v1123_v10  ;;  %v1150_v5 = vld [vmem:[#allocation13 + $0x8] sm:$0xff]   ;;  %v1153_v8 = vld [vmem:[#allocation14 + $0x30] sm:$0xff]   ;;  %v1155_v10 = vld [vmem:[#allocation14 + $0x20] sm:$0xff]  }
  0x72   :  { %985 = vmatprep.subr.bf16.mxu0 %v1408_v0  ;;  %1005 = vmatprep.subr.bf16.mxu1 %v1408_v0 }
  0x75   :  { %986 = vmatpush3.bf16.msra.mxu0 %v1116_v7  ;;  %1006 = vmatpush3.bf16.msra.mxu1 %v1124_v12  ;;  %v1152_v7 = vld [vmem:[#allocation14 + $0x38] sm:$0xff]   ;;  %v1157_v12 = vld [vmem:[#allocation14 + $0x10] sm:$0xff]  }
  0x76   :  { %987 = vmatprep.subr.bf16.mxu0 %v1408_v0  ;;  %1007 = vmatprep.subr.bf16.mxu1 %v1408_v0 }
  0x79   :  { %988 = vmatpush3.bf16.msra.mxu0 %v1117_v9  ;;  %1008 = vmatpush3.bf16.msra.mxu1 %v1125_v15  ;;  %v1154_v9 = vld [vmem:[#allocation14 + $0x28] sm:$0xff]  }
  0x7a   :  { %989 = vmatprep.subr.bf16.mxu0 %v1408_v0  ;;  %1009 = vmatprep.subr.bf16.mxu1 %v1408_v0 }
  0x7d   :  { %990 = vmatpush3.bf16.msra.mxu0 %v1118_v11  ;;  %1010 = vmatpush3.bf16.msra.mxu1 %v1126_v17  ;;  %v1156_v11 = vld [vmem:[#allocation14 + $0x18] sm:$0xff]  }
  0x7e   :  { %991 = vmatprep.subr.bf16.mxu0 %v1408_v0  ;;  %1011 = vmatprep.subr.bf16.mxu1 %v1408_v0 }
  0x81   :  { %992 = vmatpush3.bf16.msra.mxu0 %v1119_v13  ;;  %1012 = vmatpush3.bf16.msra.mxu1 %v1127_v18  ;;  %v895_v13 = vld [vmem:[%s1611_s8 + $0x3] ss:$0 sm:$0xff] }
  0x82   :  { %1017 = vmatprep.subr.bf16.mxu0 %v1408_v0  ;;  %1037 = vmatprep.subr.bf16.mxu1 %v1408_v0 }
  0x84   :  { %994 = vmatmul.mubr.bf16.vlgmr.msra.gmra.mxu0 %v144_v16 }
  0x85   :  { %1033 = vmatprep.mubr.msk.bf16.mxu0 %vm1409_vm0, %v1408_v0  ;;  %1018 = vmatpush3.bf16.msra.mxu0 %v1128_v19 }
  0x86   :  { %1019 = vmatprep.subr.bf16.mxu0 %v1408_v0 }
  0x89   :  { %1020 = vmatpush3.bf16.msra.mxu0 %v1129_v20 }
  0x8a   :  { %1021 = vmatprep.subr.bf16.mxu0 %v1408_v0 }
  0x8d   :  { %1022 = vmatpush3.bf16.msra.mxu0 %v1130_v21  ;;  %v1158_v21 = vld [vmem:[#allocation14 + $0x8] sm:$0xff]  }
  0x8e   :  { %1023 = vmatprep.subr.bf16.mxu0 %v1408_v0 }
  0x91   :  { %1024 = vmatpush3.bf16.msra.mxu0 %v1131_v22  ;;  %v1159_v22 = vld [vmem:[#allocation14] sm:$0xff]  }
  0x92   :  { %1025 = vmatprep.subr.bf16.mxu0 %v1408_v0 }
  0x95   :  { %1026 = vmatpush3.bf16.msra.mxu0 %v1132_v23  ;;  %v904_v23 = vld [vmem:[%s1611_s8 + $0x4] ss:$0 sm:$0xff] }
  0x96   :  { %1027 = vmatprep.subr.bf16.mxu0 %v1408_v0 }
  0x99   :  { %1028 = vmatpush3.bf16.msra.mxu0 %v1133_v24 }
  0x9a   :  { %1029 = vmatprep.subr.bf16.mxu0 %v1408_v0 }
  0x9d   :  { %1030 = vmatpush3.bf16.msra.mxu0 %v1134_v33 }
  0x9e   :  { %1031 = vmatprep.subr.bf16.mxu0 %v1408_v0 }
  0xa1   :  { %1032 = vmatpush3.bf16.msra.mxu0 %v1135_v34 }
  0xa2   :  { %1057 = vmatprep.subr.bf16.mxu0 %v1408_v0 }
 0x144   :  { %v248_v26 = vpop.f32.mrf.mxu0 }
 0x145   :  { %v249_v27 = vadd.f32 %v868_v25, %v248_v26 }
 0x146   :  { %v995_v28 = vpop.f32.mrf.mxu0 }
 0x147   :  { %v254_v29 = vmax.f32 %v249_v27, 0.0 }
 0x148   :  { %v251_v30 = vpop.f32.mrf.mxu0 }
 0x149   :  { %v255_v31 = vpack.c.bf16 %v254_v29, %v254_v29 }
 0x14a   :  { %v996_v32 = vpop.f32.mrf.mxu0 }
 0x14b   :  { %1014 = vmatmul.mubr.bf16.vlgmr.msra.gmra.mxu1 %v255_v31 }
 0x14c   :  { %1053 = vmatprep.mubr.msk.bf16.mxu1 %vm1409_vm0, %v1408_v0  ;;  %1038 = vmatpush3.bf16.msra.mxu1 %v1136_v43 }
 0x14d   :  { %1039 = vmatprep.subr.bf16.mxu1 %v1408_v0 }
 0x150   :  { %1040 = vmatpush3.bf16.msra.mxu1 %v1137_v44 }
 0x151   :  { %1041 = vmatprep.subr.bf16.mxu1 %v1408_v0 }
 0x154   :  { %1042 = vmatpush3.bf16.msra.mxu1 %v1138_v45 }
 0x155   :  { %1043 = vmatprep.subr.bf16.mxu1 %v1408_v0 }
 0x158   :  { %1044 = vmatpush3.bf16.msra.mxu1 %v1139_v46 }
 0x159   :  { %1045 = vmatprep.subr.bf16.mxu1 %v1408_v0 }
 0x15c   :  { %1046 = vmatpush3.bf16.msra.mxu1 %v1140_v47 }
 0x15d   :  { %1047 = vmatprep.subr.bf16.mxu1 %v1408_v0 }
 0x160   :  { %1048 = vmatpush3.bf16.msra.mxu1 %v1141_v48 }
 0x161   :  { %1049 = vmatprep.subr.bf16.mxu1 %v1408_v0 }
 0x164   :  { %1050 = vmatpush3.bf16.msra.mxu1 %v1142_v49 }
 0x165   :  { %1051 = vmatprep.subr.bf16.mxu1 %v1408_v0 }
 0x168   :  { %1052 = vmatpush3.bf16.msra.mxu1 %v1143_v50 }
 0x169   :  { %1077 = vmatprep.subr.bf16.mxu1 %v1408_v0 }
 0x20b   :  { %v359_v36 = vpop.f32.mrf.mxu1 }
 0x20c   :  { %v360_v37 = vadd.f32 %v877_v35, %v359_v36 }
 0x20d   :  { %v1015_v38 = vpop.f32.mrf.mxu1 }
 0x20e   :  { %v365_v39 = vmax.f32 %v360_v37, 0.0 }
 0x20f   :  { %v362_v40 = vpop.f32.mrf.mxu1 }
 0x210   :  { %v366_v41 = vpack.c.bf16 %v365_v39, %v365_v39 }
 0x211   :  { %v1016_v42 = vpop.f32.mrf.mxu1 }
 0x212   :  { %1034 = vmatmul.mubr.bf16.vlgmr.msra.gmra.mxu0 %v366_v41 }
 0x213   :  { %1073 = vmatprep.mubr.msk.bf16.mxu0 %vm1409_vm0, %v1408_v0  ;;  %1058 = vmatpush3.bf16.msra.mxu0 %v1144_v51 }
 0x214   :  { %1059 = vmatprep.subr.bf16.mxu0 %v1408_v0 }
 0x217   :  { %1060 = vmatpush3.bf16.msra.mxu0 %v1145_v53 }
 0x218   :  { %1061 = vmatprep.subr.bf16.mxu0 %v1408_v0 }
 0x21b   :  { %1062 = vmatpush3.bf16.msra.mxu0 %v1146_v57 }
 0x21c   :  { %1063 = vmatprep.subr.bf16.mxu0 %v1408_v0 }
 0x21f   :  { %1064 = vmatpush3.bf16.msra.mxu0 %v1147_v60 }
 0x220   :  { %1065 = vmatprep.subr.bf16.mxu0 %v1408_v0 }
 0x223   :  { %1066 = vmatpush3.bf16.msra.mxu0 %v1148_v61 }
 0x224   :  { %1067 = vmatprep.subr.bf16.mxu0 %v1408_v0 }
 0x227   :  { %1068 = vmatpush3.bf16.msra.mxu0 %v1149_v62 }
 0x228   :  { %1069 = vmatprep.subr.bf16.mxu0 %v1408_v0 }
 0x22b   :  { %1070 = vmatpush3.bf16.msra.mxu0 %v1150_v5 }
 0x22c   :  { %1071 = vmatprep.subr.bf16.mxu0 %v1408_v0 }
 0x22f   :  { %1072 = vmatpush3.bf16.msra.mxu0 %v1151_v6 }
 0x2d2   :  { %v470_v54 = vpop.f32.mrf.mxu0 }
 0x2d3   :  { %v471_v55 = vadd.f32 %v886_v52, %v470_v54 }
 0x2d4   :  { %v1035_v56 = vpop.f32.mrf.mxu0 }
 0x2d5   :  { %820 = vst [vmem:[#allocation17] sm:$0xff] %v471_v55  ;;  %476 = vrot.lane.b32.xlu0 %v471_v55, %s1401_s27 }
 0x2d6   :  { %v473_v58 = vpop.f32.mrf.mxu0 }
 0x2d8   :  { %v1036_v59 = vpop.f32.mrf.mxu0 }
 0x347   :  { %v477_v1 = vpop.permute.xlu0 %476 }
 0x348   :  { %v479_v2 = vmul.f32 %v478_v63, %v477_v1  ;;  %821 = vst [vmem:[#allocation19] sm:$0xff] %v477_v1 }
 0x34a   :  { %v480_v3 = vadd.f32 %v479_v2, %v471_v55 }
 0x34c   :  { %v481_v4 = vpack.c.bf16 %v480_v3, %v480_v3 }
 0x34e   :  { %1054 = vmatmul.mubr.bf16.vlgmr.msra.gmra.mxu1 %v481_v4 }
 0x34f   :  { %1093 = vmatprep.mubr.msk.bf16.mxu1 %vm1409_vm0, %v1408_v0  ;;  %1078 = vmatpush3.bf16.msra.mxu1 %v1152_v7 }
 0x350   :  { %1079 = vmatprep.subr.bf16.mxu1 %v1408_v0 }
 0x353   :  { %1080 = vmatpush3.bf16.msra.mxu1 %v1153_v8 }
 0x354   :  { %1081 = vmatprep.subr.bf16.mxu1 %v1408_v0 }
 0x357   :  { %1082 = vmatpush3.bf16.msra.mxu1 %v1154_v9 }
 0x358   :  { %1083 = vmatprep.subr.bf16.mxu1 %v1408_v0 }
 0x35b   :  { %1084 = vmatpush3.bf16.msra.mxu1 %v1155_v10 }
 0x35c   :  { %1085 = vmatprep.subr.bf16.mxu1 %v1408_v0 }
 0x35f   :  { %1086 = vmatpush3.bf16.msra.mxu1 %v1156_v11 }
 0x360   :  { %1087 = vmatprep.subr.bf16.mxu1 %v1408_v0 }
 0x363   :  { %1088 = vmatpush3.bf16.msra.mxu1 %v1157_v12 }
 0x364   :  { %1089 = vmatprep.subr.bf16.mxu1 %v1408_v0 }
 0x367   :  { %1090 = vmatpush3.bf16.msra.mxu1 %v1158_v21 }
 0x368   :  { %1091 = vmatprep.subr.bf16.mxu1 %v1408_v0 }
 0x36b   :  { %1092 = vmatpush3.bf16.msra.mxu1 %v1159_v22 }
 0x40e   :  { %v585_v14 = vpop.f32.mrf.mxu1 }
 0x40f   :  { %v586_v15 = vadd.f32 %v895_v13, %v585_v14 }
 0x410   :  { %v1055_v16 = vpop.f32.mrf.mxu1 }
 0x411   :  { %v591_v17 = vmax.f32 %v586_v15, 0.0 }
 0x412   :  { %v588_v18 = vpop.f32.mrf.mxu1 }
 0x413   :  { %v592_v19 = vpack.c.bf16 %v591_v17, %v591_v17 }
 0x414   :  { %v1056_v20 = vpop.f32.mrf.mxu1 }
 0x415   :  { %1074 = vmatmul.mubr.bf16.vlgmr.msra.gmra.mxu0 %v592_v19 }
 0x4d5   :  { %v696_v24 = vpop.f32.mrf.mxu0 }
 0x4d6   :  { %v697_v25 = vadd.f32 %v904_v23, %v696_v24 }
 0x4d7   :  { %v1075_v26 = vpop.f32.mrf.mxu0 }
 0x4d8   :  { %v702_v27 = vmax.f32 %v697_v25, 0.0 }
 0x4d9   :  { %v699_v28 = vpop.f32.mrf.mxu0 }
 0x4da   :  { %v703_v29 = vpack.c.bf16 %v702_v27, %v702_v27 }
 0x4db   :  { %v1076_v30 = vpop.f32.mrf.mxu0 }
 0x4dc   :  { %1094 = vmatmul.mubr.bf16.vlgmr.msra.gmra.mxu1 %v703_v29 }
 0x4dd   :  { %1335 = shalt.err (!%p1332_p2)
}
 0x4de   :  { %841 = dma.vmem_to_hbm [thread:$0]  %s839_s21, 128, %s1613_s10, [#allocation18]  }
 0x4df   :  { %s1411_s0 = smov [#allocation19]  }
 0x4e0   :  { %s848_s25 = sshll.u32 %s1411_s0, 4  ;;  %s849_s25 = int_to_ptr.vmem [resolvable:$true] %s848_s25 }
 0x4e1   :  { %s1344_s26 = scalar_lea.vmem %s849_s25, 128  ;;  %p1349_p4 = scmp.lt.s32.totalorder %s849_s25, %s849_s25 }
 0x4e2   :  { %p1345_p3 = scmp.ne.s32.totalorder %s849_s25, %s1344_s26  ;;  %p1350_p5 = scmp.lt.s32.totalorder %s1344_s26, %s1344_s26 }
 0x4e4   :  { %p1351_p6 = por %p1350_p5, %p1349_p4 }
 0x4e6   :  { %p1352_p7 = pnand %p1351_p6, %p1345_p3 }
 0x4e8   :  { %1355 = shalt.err (!%p1352_p7)
}
 0x4e9   :  { %851 = dma.vmem_to_hbm [thread:$0]  %s849_s25, 128, %s1614_s11, [#allocation18]   ;;  %v913_v0 = vld [vmem:[%s1611_s8 + $0x5] ss:$0 sm:$0xff] }
 0x4ea   :  { %s1412_s10 = smov [#allocation16]  }
 0x4eb   :  { %s828_s12 = sshll.u32 %s1412_s10, 4  ;;  %s829_s12 = int_to_ptr.vmem [resolvable:$true] %s828_s12 }
 0x4ec   :  { %s1364_s11 = scalar_lea.vmem %s829_s12, 128  ;;  %p1369_p9 = scmp.lt.s32.totalorder %s829_s12, %s829_s12 }
 0x4ed   :  { %p1365_p8 = scmp.ne.s32.totalorder %s829_s12, %s1364_s11  ;;  %p1370_p10 = scmp.lt.s32.totalorder %s1364_s11, %s1364_s11 }
 0x4ef   :  { %p1371_p11 = por %p1370_p10, %p1369_p9 }
 0x4f1   :  { %p1372_p12 = pnand %p1371_p11, %p1365_p8 }
 0x59c   :  { %v807_v31 = vpop.f32.mrf.mxu1 }
 0x59d   :  { %v808_v32 = vadd.f32 %v913_v0, %v807_v31 }
 0x59e   :  { %v1095_v33 = vpop.f32.mrf.mxu1 }
 0x59f   :  { %v922_v34 = vmul.f32 -1.442695, %v808_v32 }
 0x5a0   :  { %v810_v35 = vpop.f32.mrf.mxu1 }
 0x5a1   :  { %1160 = vpow2.f32 %v922_v34 }
 0x5a2   :  { %v1096_v36 = vpop.f32.mrf.mxu1 }
 0x5ae   :  { %v1161_v37 = vpop.eup %1160 }
 0x5af   :  { %v816_v38 = vadd.f32 1.0, %v1161_v37 }
 0x5b1   :  { %1162 = vrcp.f32 %v816_v38 }
 0x5be   :  { %v1163_v39 = vpop.eup %1162 }
 0x5bf   :  { %819 = vst [vmem:[#allocation16] sm:$0xff] %v1163_v39 }
 0x5c0   :  { %1375 = shalt.err (!%p1372_p12)
}
 0x5c1   :  { %831 = dma.vmem_to_hbm [thread:$0]  %s829_s12, 128, %s1612_s9, [#allocation4]  }
 0x5c2   :  { %1394 = dma.done.wait [#allocation4], 128  }
 0x5c3   :  { %1395 = vsyncadd [#allocation4], 4294967168 }
 0x5c4   :  { %1396 = dma.done.wait [#allocation18], 256  }
 0x5c5   :  { %1397 = vsyncadd [#allocation18], 4294967040 }
 0x5c6   :  { %861 = vsyncpa [#allocation3], 1 }
 0x5c7   :  { %862 = vsyncpa [#allocation6], 1 }
 0x5c8   :  { %863 = vsyncpa [#allocation9], 1 }
 0x5c9   :  { %864 = vsyncpa [#allocation12], 1 }
 0x5ca   :  { %865 = vsyncpa [#allocation15], 1 }
 0x5cb   :  { %866 = vsyncpa [#allocation4], 1 }
 0x5cc   :  { %867 = vsyncpa [#allocation18], 1 }

// kernel: tpu_custom_call.1
= control target key start
LH: loop header
LB: loop body
LE: loop exit
PB: predicated region body
PF: predicated region fallthrough
CT: control target
= control target key end

     0   :  { %17 = vsyncpa [#allocation3], 0  ;;  %s1603_s0 = inlined_call_operand.hbm [shape: f32[8,128], index: 0, kind: input, shape index: {}]   ;;  %s1604_s1 = inlined_call_operand.hbm [shape: f32[8,128], index: 1, kind: input, shape index: {}]   ;;  %s1605_s2 = inlined_call_operand.hbm [shape: bf16[128,128], index: 2, kind: input, shape index: {}]   ;;  %s1606_s3 = inlined_call_operand.hbm [shape: bf16[128,128], index: 3, kind: input, shape index: {}]   ;;  %s1607_s4 = inlined_call_operand.hbm [shape: bf16[128,128], index: 4, kind: input, shape index: {}]   ;;  %s1608_s5 = inlined_call_operand.hbm [shape: bf16[128,128], index: 5, kind: input, shape index: {}]   ;;  %s1609_s6 = inlined_call_operand.hbm [shape: bf16[128,128], index: 6, kind: input, shape index: {}]   ;;  %s1610_s7 = inlined_call_operand.hbm [shape: bf16[128,128], index: 7, kind: input, shape index: {}]   ;;  %s1611_s8 = inlined_call_operand.vmem [shape: f32[6,128], index: 8, kind: input, shape index: {}]   ;;  %s1612_s9 = inlined_call_operand.hbm [shape: f32[8,128], index: 9, kind: output, shape index: {0}]   ;;  %s1613_s10 = inlined_call_operand.hbm [shape: f32[8,128], index: 10, kind: output, shape index: {1}]   ;;  %s1614_s11 = inlined_call_operand.hbm [shape: f32[8,128], index: 11, kind: output, shape index: {2}]  }
   0x1   :  { %18 = vsyncpa [#allocation6], 0 }
   0x2   :  { %19 = vsyncpa [#allocation9], 0 }
   0x3   :  { %20 = vsyncpa [#allocation12], 0 }
   0x4   :  { %21 = vsyncpa [#allocation15], 0 }
   0x5   :  { %22 = vsyncpa [#allocation4], 0 }
   0x6   :  { %23 = vsyncpa [#allocation18], 0  ;;  %s1398_s17 = smov [#allocation5]  }
   0x7   :  { %s40_s18 = sshll.u32 %s1398_s17, 4  ;;  %s41_s18 = int_to_ptr.vmem [resolvable:$true] %s40_s18 }
   0x8   :  { %s1172_s19 = scalar_lea.vmem %s41_s18, 128  ;;  %p1177_p1 = scmp.lt.s32.totalorder %s41_s18, %s41_s18 }
   0x9   :  { %p1173_p0 = scmp.ne.s32.totalorder %s41_s18, %s1172_s19  ;;  %p1178_p2 = scmp.lt.s32.totalorder %s1172_s19, %s1172_s19 }
   0xb   :  { %p1179_p3 = por %p1178_p2, %p1177_p1 }
   0xd   :  { %p1180_p4 = pnand %p1179_p3, %p1173_p0 }
   0xf   :  { %1183 = shalt.err (!%p1180_p4)
}
  0x10   :  { %43 = dma.hbm_to_vmem [thread:$0]  %s1604_s1, 128, %s41_s18, [#allocation6]  }
  0x11   :  { %s1399_s22 = smov [#allocation8]   ;;  %s1400_s24 = smov [#allocation11]  }
  0x12   :  { %s61_s23 = sshll.u32 %s1399_s22, 4  ;;  %s85_s25 = sshll.u32 %s1400_s24, 4  ;;  %s62_s23 = int_to_ptr.vmem [resolvable:$true] %s61_s23  ;;  %s86_s25 = int_to_ptr.vmem [resolvable:$true] %s85_s25 }
  0x13   :  { %s1192_s26 = scalar_lea.vmem %s62_s23, 1024  ;;  %p1197_p6 = scmp.lt.s32.totalorder %s62_s23, %s62_s23 }
  0x14   :  { %p1193_p5 = scmp.ne.s32.totalorder %s62_s23, %s1192_s26  ;;  %p1198_p7 = scmp.lt.s32.totalorder %s1192_s26, %s1192_s26 }
  0x16   :  { %p1199_p8 = por %p1198_p7, %p1197_p6 }
  0x18   :  { %p1200_p9 = pnand %p1199_p8, %p1193_p5 }
  0x1a   :  { %1203 = shalt.err (!%p1200_p9)
}
  0x1b   :  { %s1401_s27 = smov 64   ;;  %s1402_s28 = smov 4  }
  0x1c   :  { %67 = dma.hbm_to_vmem [thread:$0]  %s1606_s3, 1024, %s62_s23, [#allocation9], %s1401_s27, %s1401_s27, %s1402_s28  }
  0x1d   :  { %s1212_s1 = scalar_lea.vmem %s86_s25, 1024  ;;  %p1217_p11 = scmp.lt.s32.totalorder %s86_s25, %s86_s25 }
  0x1e   :  { %p1213_p10 = scmp.ne.s32.totalorder %s86_s25, %s1212_s1  ;;  %p1218_p12 = scmp.lt.s32.totalorder %s1212_s1, %s1212_s1 }
  0x20   :  { %p1219_p13 = por %p1218_p12, %p1217_p11 }
  0x22   :  { %p1220_p0 = pnand %p1219_p13, %p1213_p10 }
  0x24   :  { %1223 = shalt.err (!%p1220_p0)
}
  0x25   :  { %91 = dma.hbm_to_vmem [thread:$0]  %s1608_s5, 1024, %s86_s25, [#allocation12], %s1401_s27, %s1401_s27, %s1402_s28  }
  0x26   :  { %s1403_s14 = smov [#allocation2]   ;;  %s1404_s16 = smov [#allocation7]  }
  0x27   :  { %s30_s15 = sshll.u32 %s1403_s14, 4  ;;  %s49_s3 = sshll.u32 %s1404_s16, 4  ;;  %s31_s15 = int_to_ptr.vmem [resolvable:$true] %s30_s15  ;;  %s50_s3 = int_to_ptr.vmem [resolvable:$true] %s49_s3 }
  0x28   :  { %s1232_s17 = scalar_lea.vmem %s31_s15, 128  ;;  %p1237_p2 = scmp.lt.s32.totalorder %s31_s15, %s31_s15 }
  0x29   :  { %p1233_p1 = scmp.ne.s32.totalorder %s31_s15, %s1232_s17  ;;  %p1238_p3 = scmp.lt.s32.totalorder %s1232_s17, %s1232_s17 }
  0x2b   :  { %p1239_p4 = por %p1238_p3, %p1237_p2 }
  0x2d   :  { %p1240_p5 = pnand %p1239_p4, %p1233_p1 }
  0x2f   :  { %1243 = shalt.err (!%p1240_p5)
}
  0x30   :  { %33 = dma.hbm_to_vmem [thread:$0]  %s1603_s0, 128, %s31_s15, [#allocation3]  }
  0x31   :  { %s1252_s20 = scalar_lea.vmem %s50_s3, 1024  ;;  %p1257_p7 = scmp.lt.s32.totalorder %s50_s3, %s50_s3 }
  0x32   :  { %p1253_p6 = scmp.ne.s32.totalorder %s50_s3, %s1252_s20  ;;  %p1258_p8 = scmp.lt.s32.totalorder %s1252_s20, %s1252_s20 }
  0x34   :  { %p1259_p9 = por %p1258_p8, %p1257_p7 }
  0x36   :  { %p1260_p10 = pnand %p1259_p9, %p1253_p6 }
  0x38   :  { %1263 = shalt.err (!%p1260_p10)
}
  0x39   :  { %55 = dma.hbm_to_vmem [thread:$0]  %s1605_s2, 1024, %s50_s3, [#allocation6], %s1401_s27, %s1401_s27, %s1402_s28  }
  0x3a   :  { %s1405_s22 = smov [#allocation10]   ;;  %s1406_s24 = smov [#allocation13]  }
  0x3b   :  { %s73_s23 = sshll.u32 %s1405_s22, 4  ;;  %s97_s0 = sshll.u32 %s1406_s24, 4  ;;  %s74_s23 = int_to_ptr.vmem [resolvable:$true] %s73_s23  ;;  %s98_s0 = int_to_ptr.vmem [resolvable:$true] %s97_s0 }
  0x3c   :  { %s1272_s25 = scalar_lea.vmem %s74_s23, 1024  ;;  %p1277_p12 = scmp.lt.s32.totalorder %s74_s23, %s74_s23 }
  0x3d   :  { %p1273_p11 = scmp.ne.s32.totalorder %s74_s23, %s1272_s25  ;;  %p1278_p13 = scmp.lt.s32.totalorder %s1272_s25, %s1272_s25 }
  0x3f   :  { %p1279_p0 = por %p1278_p13, %p1277_p12 }
  0x41   :  { %p1280_p1 = pnand %p1279_p0, %p1273_p11 }
  0x43   :  { %1283 = shalt.err (!%p1280_p1)
}
  0x44   :  { %79 = dma.hbm_to_vmem [thread:$0]  %s1607_s4, 1024, %s74_s23, [#allocation9], %s1401_s27, %s1401_s27, %s1402_s28  }
  0x45   :  { %s1292_s2 = scalar_lea.vmem %s98_s0, 1024  ;;  %p1297_p3 = scmp.lt.s32.totalorder %s98_s0, %s98_s0 }
  0x46   :  { %p1293_p2 = scmp.ne.s32.totalorder %s98_s0, %s1292_s2  ;;  %p1298_p4 = scmp.lt.s32.totalorder %s1292_s2, %s1292_s2 }
  0x48   :  { %p1299_p5 = por %p1298_p4, %p1297_p3 }
  0x4a   :  { %p1300_p6 = pnand %p1299_p5, %p1293_p2 }
  0x4c   :  { %1303 = shalt.err (!%p1300_p6)
}
  0x4d   :  { %103 = dma.hbm_to_vmem [thread:$0]  %s1609_s6, 1024, %s98_s0, [#allocation12], %s1401_s27, %s1401_s27, %s1402_s28  }
  0x4e   :  { %s1407_s12 = smov [#allocation14]  }
  0x4f   :  { %s109_s13 = sshll.u32 %s1407_s12, 4  ;;  %s110_s13 = int_to_ptr.vmem [resolvable:$true] %s109_s13 }
  0x50   :  { %s1312_s14 = scalar_lea.vmem %s110_s13, 1024  ;;  %p1317_p8 = scmp.lt.s32.totalorder %s110_s13, %s110_s13 }
  0x51   :  { %p1313_p7 = scmp.ne.s32.totalorder %s110_s13, %s1312_s14  ;;  %p1318_p9 = scmp.lt.s32.totalorder %s1312_s14, %s1312_s14 }
  0x53   :  { %p1319_p10 = por %p1318_p9, %p1317_p8 }
  0x55   :  { %p1320_p11 = pnand %p1319_p10, %p1313_p7 }
  0x57   :  { %1323 = shalt.err (!%p1320_p11)
}
  0x58   :  { %115 = dma.hbm_to_vmem [thread:$0]  %s1610_s7, 1024, %s110_s13, [#allocation15], %s1401_s27, %s1401_s27, %s1402_s28  }
  0x59   :  { %1384 = dma.done.wait [#allocation3], 128  }
  0x5a   :  { %1385 = vsyncadd [#allocation3], 4294967168 }
  0x5b   :  { %1386 = dma.done.wait [#allocation6], 1152  }
  0x5c   :  { %1387 = vsyncadd [#allocation6], 4294966144 }
  0x5d   :  { %1388 = dma.done.wait [#allocation9], 2048  }
  0x5e   :  { %1389 = vsyncadd [#allocation9], 4294965248 }
  0x5f   :  { %1390 = dma.done.wait [#allocation12], 2048  }
  0x60   :  { %1391 = vsyncadd [#allocation12], 4294965248 }
  0x61   :  { %1392 = dma.done.wait [#allocation15], 1024  }
  0x62   :  { %1393 = vsyncadd [#allocation15], 4294966272  ;;  %v1408_v0 = vmov 0.0   ;;  %vm1409_vm0 = vmmov 0   ;;  %v1112_v1 = vld [vmem:[#allocation7 + $0x38] sm:$0xff]   ;;  %v1113_v2 = vld [vmem:[#allocation7 + $0x30] sm:$0xff]  }
  0x63   :  { %977 = vmatprep.subr.bf16.mxu0 %v1408_v0  ;;  %993 = vmatprep.mubr.msk.bf16.mxu0 %vm1409_vm0, %v1408_v0  ;;  %v1114_v3 = vld [vmem:[#allocation7 + $0x28] sm:$0xff]   ;;  %v1120_v4 = vld [vmem:[#allocation8 + $0x38] sm:$0xff]   ;;  %v1115_v5 = vld [vmem:[#allocation7 + $0x20] sm:$0xff]   ;;  %s1410_s5 = smov [#allocation17]  }
  0x64   :  { %997 = vmatprep.subr.bf16.mxu1 %v1408_v0  ;;  %1013 = vmatprep.mubr.msk.bf16.mxu1 %vm1409_vm0, %v1408_v0  ;;  %v1121_v6 = vld [vmem:[#allocation8 + $0x30] sm:$0xff]   ;;  %v1116_v7 = vld [vmem:[#allocation7 + $0x18] sm:$0xff]   ;;  %v1122_v8 = vld [vmem:[#allocation8 + $0x28] sm:$0xff]   ;;  %s838_s21 = sshll.u32 %s1410_s5, 4  ;;  %s839_s21 = int_to_ptr.vmem [resolvable:$true] %s838_s21 }
  0x65   :  { %978 = vmatpush3.bf16.msra.mxu0 %v1112_v1  ;;  %998 = vmatpush3.bf16.msra.mxu1 %v1120_v4  ;;  %v1117_v9 = vld [vmem:[#allocation7 + $0x10] sm:$0xff]   ;;  %v1123_v10 = vld [vmem:[#allocation8 + $0x20] sm:$0xff]   ;;  %v1118_v11 = vld [vmem:[#allocation7 + $0x8] sm:$0xff]   ;;  %s1324_s22 = scalar_lea.vmem %s839_s21, 128  ;;  %p1329_p13 = scmp.lt.s32.totalorder %s839_s21, %s839_s21 }
  0x66   :  { %979 = vmatprep.subr.bf16.mxu0 %v1408_v0  ;;  %999 = vmatprep.subr.bf16.mxu1 %v1408_v0  ;;  %v1124_v12 = vld [vmem:[#allocation8 + $0x18] sm:$0xff]   ;;  %v1119_v13 = vld [vmem:[#allocation7] sm:$0xff]   ;;  %v143_v14 = vld [vmem:[#allocation2] sm:$0xff]  ;;  %p1325_p12 = scmp.ne.s32.totalorder %s839_s21, %s1324_s22  ;;  %p1330_p0 = scmp.lt.s32.totalorder %s1324_s22, %s1324_s22 }
  0x67   :  { %v1125_v15 = vld [vmem:[#allocation8 + $0x10] sm:$0xff]   ;;  %v144_v16 = vpack.c.bf16 %v143_v14, %v143_v14  ;;  %v1126_v17 = vld [vmem:[#allocation8 + $0x8] sm:$0xff]   ;;  %v1127_v18 = vld [vmem:[#allocation8] sm:$0xff]  }
  0x68   :  { %v1128_v19 = vld [vmem:[#allocation10 + $0x38] sm:$0xff]   ;;  %v1129_v20 = vld [vmem:[#allocation10 + $0x30] sm:$0xff]   ;;  %v1130_v21 = vld [vmem:[#allocation10 + $0x28] sm:$0xff]   ;;  %p1331_p1 = por %p1330_p0, %p1329_p13 }
  0x69   :  { %980 = vmatpush3.bf16.msra.mxu0 %v1113_v2  ;;  %1000 = vmatpush3.bf16.msra.mxu1 %v1121_v6  ;;  %v1131_v22 = vld [vmem:[#allocation10 + $0x20] sm:$0xff]   ;;  %v1132_v23 = vld [vmem:[#allocation10 + $0x18] sm:$0xff]   ;;  %v1133_v24 = vld [vmem:[#allocation10 + $0x10] sm:$0xff]  }
  0x6a   :  { %981 = vmatprep.subr.bf16.mxu0 %v1408_v0  ;;  %1001 = vmatprep.subr.bf16.mxu1 %v1408_v0  ;;  %v868_v25 = vld [vmem:[%s1611_s8] ss:$0 sm:$0xff]  ;;  %v1134_v33 = vld [vmem:[#allocation10 + $0x8] sm:$0xff]   ;;  %v1135_v34 = vld [vmem:[#allocation10] sm:$0xff]   ;;  %p1332_p2 = pnand %p1331_p1, %p1325_p12 }
  0x6b   :  { %v877_v35 = vld [vmem:[%s1611_s8 + $0x1] ss:$0 sm:$0xff]  ;;  %v1136_v43 = vld [vmem:[#allocation11 + $0x38] sm:$0xff]   ;;  %v1138_v45 = vld [vmem:[#allocation11 + $0x28] sm:$0xff]  }
  0x6c   :  { %v1137_v44 = vld [vmem:[#allocation11 + $0x30] sm:$0xff]   ;;  %v1139_v46 = vld [vmem:[#allocation11 + $0x20] sm:$0xff]   ;;  %v1140_v47 = vld [vmem:[#allocation11 + $0x18] sm:$0xff]  }
  0x6d   :  { %982 = vmatpush3.bf16.msra.mxu0 %v1114_v3  ;;  %1002 = vmatpush3.bf16.msra.mxu1 %v1122_v8  ;;  %v1141_v48 = vld [vmem:[#allocation11 + $0x10] sm:$0xff]   ;;  %v1142_v49 = vld [vmem:[#allocation11 + $0x8] sm:$0xff]   ;;  %v1143_v50 = vld [vmem:[#allocation11] sm:$0xff]  }
  0x6e   :  { %983 = vmatprep.subr.bf16.mxu0 %v1408_v0  ;;  %1003 = vmatprep.subr.bf16.mxu1 %v1408_v0  ;;  %v1144_v51 = vld [vmem:[#allocation13 + $0x38] sm:$0xff]   ;;  %v886_v52 = vld [vmem:[%s1611_s8 + $0x2] ss:$0 sm:$0xff]  ;;  %v1146_v57 = vld [vmem:[#allocation13 + $0x28] sm:$0xff]  }
  0x6f   :  { %v1145_v53 = vld [vmem:[#allocation13 + $0x30] sm:$0xff]   ;;  %v1147_v60 = vld [vmem:[#allocation13 + $0x20] sm:$0xff]   ;;  %v1148_v61 = vld [vmem:[#allocation13 + $0x18] sm:$0xff]  }
  0x70   :  { %v1149_v62 = vld [vmem:[#allocation13 + $0x10] sm:$0xff]   ;;  %v478_v63 = vld [vmem:[#allocation5] sm:$0xff]  ;;  %v1151_v6 = vld [vmem:[#allocation13] sm:$0xff]  }
  0x71   :  { %984 = vmatpush3.bf16.msra.mxu0 %v1115_v5  ;;  %1004 = vmatpush3.bf16.msra.mxu1 %v1123_v10  ;;  %v1150_v5 = vld [vmem:[#allocation13 + $0x8] sm:$0xff]   ;;  %v1153_v8 = vld [vmem:[#allocation14 + $0x30] sm:$0xff]   ;;  %v1155_v10 = vld [vmem:[#allocation14 + $0x20] sm:$0xff]  }
  0x72   :  { %985 = vmatprep.subr.bf16.mxu0 %v1408_v0  ;;  %1005 = vmatprep.subr.bf16.mxu1 %v1408_v0 }
  0x75   :  { %986 = vmatpush3.bf16.msra.mxu0 %v1116_v7  ;;  %1006 = vmatpush3.bf16.msra.mxu1 %v1124_v12  ;;  %v1152_v7 = vld [vmem:[#allocation14 + $0x38] sm:$0xff]   ;;  %v1157_v12 = vld [vmem:[#allocation14 + $0x10] sm:$0xff]  }
  0x76   :  { %987 = vmatprep.subr.bf16.mxu0 %v1408_v0  ;;  %1007 = vmatprep.subr.bf16.mxu1 %v1408_v0 }
  0x79   :  { %988 = vmatpush3.bf16.msra.mxu0 %v1117_v9  ;;  %1008 = vmatpush3.bf16.msra.mxu1 %v1125_v15  ;;  %v1154_v9 = vld [vmem:[#allocation14 + $0x28] sm:$0xff]  }
  0x7a   :  { %989 = vmatprep.subr.bf16.mxu0 %v1408_v0  ;;  %1009 = vmatprep.subr.bf16.mxu1 %v1408_v0 }
  0x7d   :  { %990 = vmatpush3.bf16.msra.mxu0 %v1118_v11  ;;  %1010 = vmatpush3.bf16.msra.mxu1 %v1126_v17  ;;  %v1156_v11 = vld [vmem:[#allocation14 + $0x18] sm:$0xff]  }
  0x7e   :  { %991 = vmatprep.subr.bf16.mxu0 %v1408_v0  ;;  %1011 = vmatprep.subr.bf16.mxu1 %v1408_v0 }
  0x81   :  { %992 = vmatpush3.bf16.msra.mxu0 %v1119_v13  ;;  %1012 = vmatpush3.bf16.msra.mxu1 %v1127_v18  ;;  %v895_v13 = vld [vmem:[%s1611_s8 + $0x3] ss:$0 sm:$0xff] }
  0x82   :  { %1017 = vmatprep.subr.bf16.mxu0 %v1408_v0  ;;  %1037 = vmatprep.subr.bf16.mxu1 %v1408_v0 }
  0x84   :  { %994 = vmatmul.mubr.bf16.vlgmr.msra.gmra.mxu0 %v144_v16 }
  0x85   :  { %1033 = vmatprep.mubr.msk.bf16.mxu0 %vm1409_vm0, %v1408_v0  ;;  %1018 = vmatpush3.bf16.msra.mxu0 %v1128_v19 }
  0x86   :  { %1019 = vmatprep.subr.bf16.mxu0 %v1408_v0 }
  0x89   :  { %1020 = vmatpush3.bf16.msra.mxu0 %v1129_v20 }
  0x8a   :  { %1021 = vmatprep.subr.bf16.mxu0 %v1408_v0 }
  0x8d   :  { %1022 = vmatpush3.bf16.msra.mxu0 %v1130_v21  ;;  %v1158_v21 = vld [vmem:[#allocation14 + $0x8] sm:$0xff]  }
  0x8e   :  { %1023 = vmatprep.subr.bf16.mxu0 %v1408_v0 }
  0x91   :  { %1024 = vmatpush3.bf16.msra.mxu0 %v1131_v22  ;;  %v1159_v22 = vld [vmem:[#allocation14] sm:$0xff]  }
  0x92   :  { %1025 = vmatprep.subr.bf16.mxu0 %v1408_v0 }
  0x95   :  { %1026 = vmatpush3.bf16.msra.mxu0 %v1132_v23  ;;  %v904_v23 = vld [vmem:[%s1611_s8 + $0x4] ss:$0 sm:$0xff] }
  0x96   :  { %1027 = vmatprep.subr.bf16.mxu0 %v1408_v0 }
  0x99   :  { %1028 = vmatpush3.bf16.msra.mxu0 %v1133_v24 }
  0x9a   :  { %1029 = vmatprep.subr.bf16.mxu0 %v1408_v0 }
  0x9d   :  { %1030 = vmatpush3.bf16.msra.mxu0 %v1134_v33 }
  0x9e   :  { %1031 = vmatprep.subr.bf16.mxu0 %v1408_v0 }
  0xa1   :  { %1032 = vmatpush3.bf16.msra.mxu0 %v1135_v34 }
  0xa2   :  { %1057 = vmatprep.subr.bf16.mxu0 %v1408_v0 }
 0x144   :  { %v248_v26 = vpop.f32.mrf.mxu0 }
 0x145   :  { %v249_v27 = vadd.f32 %v868_v25, %v248_v26 }
 0x146   :  { %v995_v28 = vpop.f32.mrf.mxu0 }
 0x147   :  { %v254_v29 = vmax.f32 %v249_v27, 0.0 }
 0x148   :  { %v251_v30 = vpop.f32.mrf.mxu0 }
 0x149   :  { %v255_v31 = vpack.c.bf16 %v254_v29, %v254_v29 }
 0x14a   :  { %v996_v32 = vpop.f32.mrf.mxu0 }
 0x14b   :  { %1014 = vmatmul.mubr.bf16.vlgmr.msra.gmra.mxu1 %v255_v31 }
 0x14c   :  { %1053 = vmatprep.mubr.msk.bf16.mxu1 %vm1409_vm0, %v1408_v0  ;;  %1038 = vmatpush3.bf16.msra.mxu1 %v1136_v43 }
 0x14d   :  { %1039 = vmatprep.subr.bf16.mxu1 %v1408_v0 }
 0x150   :  { %1040 = vmatpush3.bf16.msra.mxu1 %v1137_v44 }
 0x151   :  { %1041 = vmatprep.subr.bf16.mxu1 %v1408_v0 }
 0x154   :  { %1042 = vmatpush3.bf16.msra.mxu1 %v1138_v45 }
 0x155   :  { %1043 = vmatprep.subr.bf16.mxu1 %v1408_v0 }
 0x158   :  { %1044 = vmatpush3.bf16.msra.mxu1 %v1139_v46 }
 0x159   :  { %1045 = vmatprep.subr.bf16.mxu1 %v1408_v0 }
 0x15c   :  { %1046 = vmatpush3.bf16.msra.mxu1 %v1140_v47 }
 0x15d   :  { %1047 = vmatprep.subr.bf16.mxu1 %v1408_v0 }
 0x160   :  { %1048 = vmatpush3.bf16.msra.mxu1 %v1141_v48 }
 0x161   :  { %1049 = vmatprep.subr.bf16.mxu1 %v1408_v0 }
 0x164   :  { %1050 = vmatpush3.bf16.msra.mxu1 %v1142_v49 }
 0x165   :  { %1051 = vmatprep.subr.bf16.mxu1 %v1408_v0 }
 0x168   :  { %1052 = vmatpush3.bf16.msra.mxu1 %v1143_v50 }
 0x169   :  { %1077 = vmatprep.subr.bf16.mxu1 %v1408_v0 }
 0x20b   :  { %v359_v36 = vpop.f32.mrf.mxu1 }
 0x20c   :  { %v360_v37 = vadd.f32 %v877_v35, %v359_v36 }
 0x20d   :  { %v1015_v38 = vpop.f32.mrf.mxu1 }
 0x20e   :  { %v365_v39 = vmax.f32 %v360_v37, 0.0 }
 0x20f   :  { %v362_v40 = vpop.f32.mrf.mxu1 }
 0x210   :  { %v366_v41 = vpack.c.bf16 %v365_v39, %v365_v39 }
 0x211   :  { %v1016_v42 = vpop.f32.mrf.mxu1 }
 0x212   :  { %1034 = vmatmul.mubr.bf16.vlgmr.msra.gmra.mxu0 %v366_v41 }
 0x213   :  { %1073 = vmatprep.mubr.msk.bf16.mxu0 %vm1409_vm0, %v1408_v0  ;;  %1058 = vmatpush3.bf16.msra.mxu0 %v1144_v51 }
 0x214   :  { %1059 = vmatprep.subr.bf16.mxu0 %v1408_v0 }
 0x217   :  { %1060 = vmatpush3.bf16.msra.mxu0 %v1145_v53 }
 0x218   :  { %1061 = vmatprep.subr.bf16.mxu0 %v1408_v0 }
 0x21b   :  { %1062 = vmatpush3.bf16.msra.mxu0 %v1146_v57 }
 0x21c   :  { %1063 = vmatprep.subr.bf16.mxu0 %v1408_v0 }
 0x21f   :  { %1064 = vmatpush3.bf16.msra.mxu0 %v1147_v60 }
 0x220   :  { %1065 = vmatprep.subr.bf16.mxu0 %v1408_v0 }
 0x223   :  { %1066 = vmatpush3.bf16.msra.mxu0 %v1148_v61 }
 0x224   :  { %1067 = vmatprep.subr.bf16.mxu0 %v1408_v0 }
 0x227   :  { %1068 = vmatpush3.bf16.msra.mxu0 %v1149_v62 }
 0x228   :  { %1069 = vmatprep.subr.bf16.mxu0 %v1408_v0 }
 0x22b   :  { %1070 = vmatpush3.bf16.msra.mxu0 %v1150_v5 }
 0x22c   :  { %1071 = vmatprep.subr.bf16.mxu0 %v1408_v0 }
 0x22f   :  { %1072 = vmatpush3.bf16.msra.mxu0 %v1151_v6 }
 0x2d2   :  { %v470_v54 = vpop.f32.mrf.mxu0 }
 0x2d3   :  { %v471_v55 = vadd.f32 %v886_v52, %v470_v54 }
 0x2d4   :  { %v1035_v56 = vpop.f32.mrf.mxu0 }
 0x2d5   :  { %820 = vst [vmem:[#allocation17] sm:$0xff] %v471_v55  ;;  %476 = vrot.lane.b32.xlu0 %v471_v55, %s1401_s27 }
 0x2d6   :  { %v473_v58 = vpop.f32.mrf.mxu0 }
 0x2d8   :  { %v1036_v59 = vpop.f32.mrf.mxu0 }
 0x347   :  { %v477_v1 = vpop.permute.xlu0 %476 }
 0x348   :  { %v479_v2 = vmul.f32 %v478_v63, %v477_v1  ;;  %821 = vst [vmem:[#allocation19] sm:$0xff] %v477_v1 }
 0x34a   :  { %v480_v3 = vadd.f32 %v479_v2, %v471_v55 }
 0x34c   :  { %v481_v4 = vpack.c.bf16 %v480_v3, %v480_v3 }
 0x34e   :  { %1054 = vmatmul.mubr.bf16.vlgmr.msra.gmra.mxu1 %v481_v4 }
 0x34f   :  { %1093 = vmatprep.mubr.msk.bf16.mxu1 %vm1409_vm0, %v1408_v0  ;;  %1078 = vmatpush3.bf16.msra.mxu1 %v1152_v7 }
 0x350   :  { %1079 = vmatprep.subr.bf16.mxu1 %v1408_v0 }
 0x353   :  { %1080 = vmatpush3.bf16.msra.mxu1 %v1153_v8 }
 0x354   :  { %1081 = vmatprep.subr.bf16.mxu1 %v1408_v0 }
 0x357   :  { %1082 = vmatpush3.bf16.msra.mxu1 %v1154_v9 }
 0x358   :  { %1083 = vmatprep.subr.bf16.mxu1 %v1408_v0 }
 0x35b   :  { %1084 = vmatpush3.bf16.msra.mxu1 %v1155_v10 }
 0x35c   :  { %1085 = vmatprep.subr.bf16.mxu1 %v1408_v0 }
 0x35f   :  { %1086 = vmatpush3.bf16.msra.mxu1 %v1156_v11 }
 0x360   :  { %1087 = vmatprep.subr.bf16.mxu1 %v1408_v0 }
 0x363   :  { %1088 = vmatpush3.bf16.msra.mxu1 %v1157_v12 }
 0x364   :  { %1089 = vmatprep.subr.bf16.mxu1 %v1408_v0 }
 0x367   :  { %1090 = vmatpush3.bf16.msra.mxu1 %v1158_v21 }
 0x368   :  { %1091 = vmatprep.subr.bf16.mxu1 %v1408_v0 }
 0x36b   :  { %1092 = vmatpush3.bf16.msra.mxu1 %v1159_v22 }
 0x40e   :  { %v585_v14 = vpop.f32.mrf.mxu1 }
 0x40f   :  { %v586_v15 = vadd.f32 %v895_v13, %v585_v14 }
 0x410   :  { %v1055_v16 = vpop.f32.mrf.mxu1 }
 0x411   :  { %v591_v17 = vmax.f32 %v586_v15, 0.0 }
 0x412   :  { %v588_v18 = vpop.f32.mrf.mxu1 }
 0x413   :  { %v592_v19 = vpack.c.bf16 %v591_v17, %v591_v17 }
 0x414   :  { %v1056_v20 = vpop.f32.mrf.mxu1 }
 0x415   :  { %1074 = vmatmul.mubr.bf16.vlgmr.msra.gmra.mxu0 %v592_v19 }
 0x4d5   :  { %v696_v24 = vpop.f32.mrf.mxu0 }
 0x4d6   :  { %v697_v25 = vadd.f32 %v904_v23, %v696_v24 }
 0x4d7   :  { %v1075_v26 = vpop.f32.mrf.mxu0 }
 0x4d8   :  { %v702_v27 = vmax.f32 %v697_v25, 0.0 }
 0x4d9   :  { %v699_v28 = vpop.f32.mrf.mxu0 }
 0x4da   :  { %v703_v29 = vpack.c.bf16 %v702_v27, %v702_v27 }
 0x4db   :  { %v1076_v30 = vpop.f32.mrf.mxu0 }
 0x4dc   :  { %1094 = vmatmul.mubr.bf16.vlgmr.msra.gmra.mxu1 %v703_v29 }
 0x4dd   :  { %1335 = shalt.err (!%p1332_p2)
}
 0x4de   :  { %841 = dma.vmem_to_hbm [thread:$0]  %s839_s21, 128, %s1613_s10, [#allocation18]  }
 0x4df   :  { %s1411_s0 = smov [#allocation19]  }
 0x4e0   :  { %s848_s25 = sshll.u32 %s1411_s0, 4  ;;  %s849_s25 = int_to_ptr.vmem [resolvable:$true] %s848_s25 }
 0x4e1   :  { %s1344_s26 = scalar_lea.vmem %s849_s25, 128  ;;  %p1349_p4 = scmp.lt.s32.totalorder %s849_s25, %s849_s25 }
 0x4e2   :  { %p1345_p3 = scmp.ne.s32.totalorder %s849_s25, %s1344_s26  ;;  %p1350_p5 = scmp.lt.s32.totalorder %s1344_s26, %s1344_s26 }
 0x4e4   :  { %p1351_p6 = por %p1350_p5, %p1349_p4 }
 0x4e6   :  { %p1352_p7 = pnand %p1351_p6, %p1345_p3 }
 0x4e8   :  { %1355 = shalt.err (!%p1352_p7)
}
 0x4e9   :  { %851 = dma.vmem_to_hbm [thread:$0]  %s849_s25, 128, %s1614_s11, [#allocation18]   ;;  %v913_v0 = vld [vmem:[%s1611_s8 + $0x5] ss:$0 sm:$0xff] }
 0x4ea   :  { %s1412_s10 = smov [#allocation16]  }
 0x4eb   :  { %s828_s12 = sshll.u32 %s1412_s10, 4  ;;  %s829_s12 = int_to_ptr.vmem [resolvable:$true] %s828_s12 }
 0x4ec   :  { %s1364_s11 = scalar_lea.vmem %s829_s12, 128  ;;  %p1369_p9 = scmp.lt.s32.totalorder %s829_s12, %s829_s12 }
 0x4ed   :  { %p1365_p8 = scmp.ne.s32.totalorder %s829_s12, %s1364_s11  ;;  %p1370_p10 = scmp.lt.s32.totalorder %s1364_s11, %s1364_s11 }
 0x4ef   :  { %p1371_p11 = por %p1370_p10, %p1369_p9 }
 0x4f1   :  { %p1372_p12 = pnand %p1371_p11, %p1365_p8 }
 0x59c   :  { %v807_v31 = vpop.f32.mrf.mxu1 }
 0x59d   :  { %v808_v32 = vadd.f32 %v913_v0, %v807_v31 }
 0x59e   :  { %v1095_v33 = vpop.f32.mrf.mxu1 }
 0x59f   :  { %v922_v34 = vmul.f32 -1.442695, %v808_v32 }
 0x5a0   :  { %v810_v35 = vpop.f32.mrf.mxu1 }
 0x5a1   :  { %1160 = vpow2.f32 %v922_v34 }
 0x5a2   :  { %v1096_v36 = vpop.f32.mrf.mxu1 }
 0x5ae   :  { %v1161_v37 = vpop.eup %1160 }
 0x5af   :  { %v816_v38 = vadd.f32 1.0, %v1161_v37 }
 0x5b1   :  { %1162 = vrcp.f32 %v816_v38 }
 0x5be   :  { %v1163_v39 = vpop.eup %1162 }
 0x5bf   :  { %819 = vst [vmem:[#allocation16] sm:$0xff] %v1163_v39 }
 0x5c0   :  { %1375 = shalt.err (!%p1372_p12)
}
 0x5c1   :  { %831 = dma.vmem_to_hbm [thread:$0]  %s829_s12, 128, %s1612_s9, [#allocation4]  }
 0x5c2   :  { %1394 = dma.done.wait [#allocation4], 128  }
 0x5c3   :  { %1395 = vsyncadd [#allocation4], 4294967168 }
 0x5c4   :  { %1396 = dma.done.wait [#allocation18], 256  }
 0x5c5   :  { %1397 = vsyncadd [#allocation18], 4294967040 }
 0x5c6   :  { %861 = vsyncpa [#allocation3], 1 }
 0x5c7   :  { %862 = vsyncpa [#allocation6], 1 }
 0x5c8   :  { %863 = vsyncpa [#allocation9], 1 }
 0x5c9   :  { %864 = vsyncpa [#allocation12], 1 }
 0x5ca   :  { %865 = vsyncpa [#allocation15], 1 }
 0x5cb   :  { %866 = vsyncpa [#allocation4], 1 }
 0x5cc   :  { %867 = vsyncpa [#allocation18], 1 }

</bundles_post_ra>
